<compile_context>
chip_gen: v6e
topology: v6e:2x2x1
jax: 0.10.0
libtpu: 0.0.40
codegen_flags: <defaults>
</compile_context>

<pallas_src>
import functools

import jax
import jax.numpy as jnp
import numpy as np
from jax.experimental import pallas as pl
from jax.experimental.pallas import tpu as pltpu

_LANE = 128
_SQRT_HALF = 0.7071067811865476  # 1/sqrt(2)


def _round_up(x, m):
    return ((x + m - 1) // m) * m


def _ffb_kernel(x_ref, w1_ref, b1_ref, w2_ref, b2_ref, g_ref,
                o_ref, ssq_ref, scale_ref, *h_cache,
                c_real, c4_real, hw_real, tile_hw, cache_h, mask_rows):
    """Two-phase fused FeedForwardBlock body.

    grid = (B, phase, HW_tiles).  Phase 0 sweeps the HW tiles of one batch
    element, computes LN -> matmul1 -> GELU, accumulates the GRN statistic
    sum_{H,W}(h^2) per channel into `ssq_ref` and (when it fits) caches h in
    bf16.  Phase 1 builds the GRN scale row once, then per tile applies the
    scale, runs matmul2 and adds the residual.
    """
    p = pl.program_id(1)
    t = pl.program_id(2)
    cp = x_ref.shape[-1]
    mask_ch = (c_real != cp)

    def compute_h():
        # LayerNorm over the real channel dim (eps=1e-6, biased variance).
        # Padded channels of x are zero, so plain sums cover only the real
        # channels; the variance needs a mask so padded (0-mu)^2 terms drop.
        x = x_ref[0].astype(jnp.float32)                       # (tile_hw, Cp)
        inv_c = jnp.float32(1.0 / c_real)
        mu = jnp.sum(x, axis=-1, keepdims=True) * inv_c
        d = x - mu
        if mask_ch:
            cm = (jax.lax.broadcasted_iota(jnp.int32, (1, cp), 1) < c_real
                  ).astype(jnp.float32)
            var = jnp.sum(d * d * cm, axis=-1, keepdims=True) * inv_c
        else:
            var = jnp.sum(d * d, axis=-1, keepdims=True) * inv_c
        xn = d * jax.lax.rsqrt(var + 1e-6)
        # Linear(C, 4C): bf16 MXU matmul, f32 accumulation.
        h = jnp.dot(xn.astype(jnp.bfloat16), w1_ref[...],
                    preferred_element_type=jnp.float32) + b1_ref[...]
        # exact (erf) GELU — matches torch.nn.GELU() default semantics.
        return 0.5 * h * (1.0 + jax.lax.erf(h * _SQRT_HALF))

    # ---------------- phase 0: GRN statistic (+ optional h cache) ----------
    @pl.when(jnp.logical_and(p == 0, t == 0))
    def _init():
        ssq_ref[...] = jnp.zeros_like(ssq_ref)

    @pl.when(p == 0)
    def _accum():
        h = compute_h()
        if cache_h:
            h_cache[0][t] = h.astype(jnp.bfloat16)
        hh = h * h
        if mask_rows:
            # HW was zero-padded to a tile multiple; keep padded rows (which
            # produce GELU(b1) != 0) out of the GRN statistic.
            row = (jax.lax.broadcasted_iota(jnp.int32, (tile_hw, 1), 0)
                   + t * tile_hw)
            hh = jnp.where(row < hw_real, hh, 0.0)
        ssq_ref[...] = ssq_ref[...] + jnp.sum(hh, axis=0, keepdims=True)

    # ------------- phase 1: GRN scale + Linear(4C, C) + residual -----------
    @pl.when(jnp.logical_and(p == 1, t == 0))
    def _make_scale():
        gx = jnp.sqrt(ssq_ref[...])                            # (1, C4p)
        denom = (jnp.sum(gx, axis=-1, keepdims=True)
                 * jnp.float32(1.0 / c4_real) + 1e-6)
        # Exact divide: denom is a scalar, approx reciprocal saves nothing.
        scale_ref[...] = g_ref[...] * (gx / denom) + 1.0

    @pl.when(p == 1)
    def _emit():
        if cache_h:
            h = h_cache[0][t]                                  # bf16 cache hit
        else:
            h = compute_h()                                    # recompute path
        # Dropout(p=0.0) is the identity; beta is folded into b2 (wrapper).
        hg = (h * scale_ref[...]).astype(jnp.bfloat16)
        y = jnp.dot(hg, w2_ref[...],
                    preferred_element_type=jnp.float32) + b2_ref[...]
        o_ref[0] = (x_ref[0].astype(jnp.float32) + y).astype(o_ref.dtype)


def _vmem_limit_bytes():
    """Generation-aware VMEM limit: ~52 MiB on 64-MiB parts (v7x), ~100 MiB
    on 128-MiB parts (v5e/v6e)."""
    cap = 128 * 1024 * 1024
    try:
        cap = int(pltpu.get_tpu_info().vmem_capacity_bytes)
    except Exception:
        pass  # fall back to the 128 MiB assumption
    if cap <= 64 * 1024 * 1024:
        return 52 * 1024 * 1024
    return 100 * 1024 * 1024


def _plan(hw, cp, c4p, x_itemsize, budget):
    """Pick (tile_hw, hw_pad, n_tiles, cache_h) under a VMEM byte budget."""
    hw8 = _round_up(hw, 8)
    if hw8 <= 1024:
        cands = [hw8]
    else:
        # Exact divisors of the sublane-padded HW in [256, 1024] (no padded
        # rows), then padded fallbacks, then last-resort small tiles.
        cands = [c for c in range(1024, 255, -8) if hw8 % c == 0]
        cands += [1024, 512, 256]
    cands += [128, 64, 32, 16, 8]

    weights = 2 * 2 * (cp * c4p + c4p * cp)     # double-buffered bf16 w1 + w2
    rows = 6 * 2 * 4 * c4p                      # small (1, C4p/Cp) operands

    for cand in cands:
        tile = min(cand, hw8)
        hw_pad = _round_up(hw, tile)
        n_tiles = hw_pad // tile
        io = 2 * 2 * tile * cp * x_itemsize     # x in + out, double-buffered
        temps = 3 * tile * c4p * 4              # live f32 (tile, 4C) values
        base = weights + rows + io + temps
        if base > budget:
            continue
        cache_bytes = hw_pad * c4p * 2          # bf16 h cache for one batch
        cache_h = (base + cache_bytes) <= budget
        return tile, hw_pad, n_tiles, cache_h

    # Nothing fit — smallest tile, recompute path; let the compiler try.
    tile = 8
    hw_pad = _round_up(hw, tile)
    return tile, hw_pad, hw_pad // tile, False


def feed_forward_block(x_nchw, params):
    """x_nchw: (B, C, H, W). params = (w1, b1, w2, b2, gamma, beta)."""
    w1, b1, w2, b2, gamma, beta = params
    B, C, H, W = x_nchw.shape
    HW = H * W
    C4 = 4 * C
    Cp = _round_up(C, _LANE)
    C4p = _round_up(C4, _LANE)

    vmem_limit = _vmem_limit_bytes()
    tile_hw, HW_pad, n_tiles, cache_h = _plan(
        HW, Cp, C4p, x_nchw.dtype.itemsize, vmem_limit - 6 * 1024 * 1024)

    # NCHW -> NHWC -> (B, HW, Cp): channels zero-padded to a lane multiple
    # (dense vregs / unmasked stores / full MXU K,N — free when C % 128 == 0,
    # as in real ConvNeXt widths) and HW zero-padded to a tile multiple.
    # TODO(synk): keep activations NHWC end-to-end in the surrounding model so
    # these two wrapper transposes (extra HBM passes) disappear.
    x = jnp.transpose(x_nchw, (0, 2, 3, 1)).reshape(B, HW, C)
    x = jnp.pad(x, ((0, 0), (0, HW_pad - HW), (0, Cp - C)))

    f32 = jnp.float32
    w1f = w1.astype(f32)
    w2f = w2.astype(f32)
    w1p = jnp.zeros((Cp, C4p), jnp.bfloat16).at[:C, :C4].set(w1f.astype(jnp.bfloat16))
    w2p = jnp.zeros((C4p, Cp), jnp.bfloat16).at[:C4, :C].set(w2f.astype(jnp.bfloat16))
    b1p = jnp.zeros((1, C4p), f32).at[:, :C4].set(b1.reshape(1, C4).astype(f32))
    # Fold beta into the second Linear's bias:
    #   (gamma*(h*Nx) + beta + h) @ W2 + b2  ==  (h*(gamma*Nx+1)) @ W2 + (beta@W2 + b2)
    b2_eff = beta.reshape(1, C4).astype(f32) @ w2f + b2.reshape(1, C).astype(f32)
    b2p = jnp.zeros((1, Cp), f32).at[:, :C].set(b2_eff)
    gp = jnp.zeros((1, C4p), f32).at[:, :C4].set(gamma.reshape(1, C4).astype(f32))

    kernel = functools.partial(
        _ffb_kernel, c_real=C, c4_real=C4, hw_real=HW, tile_hw=tile_hw,
        cache_h=cache_h, mask_rows=(HW_pad != HW))

    scratch_shapes = [
        pltpu.VMEM((1, C4p), jnp.float32),   # sum_{HW} h^2   (GRN statistic)
        pltpu.VMEM((1, C4p), jnp.float32),   # gamma*Nx + 1   (GRN scale row)
    ]
    if cache_h:
        scratch_shapes.append(pltpu.VMEM((n_tiles, tile_hw, C4p), jnp.bfloat16))

    out = pl.pallas_call(
        kernel,
        out_shape=jax.ShapeDtypeStruct((B, HW_pad, Cp), x.dtype),
        grid_spec=pltpu.PrefetchScalarGridSpec(
            num_scalar_prefetch=0,
            grid=(B, 2, n_tiles),                    # (batch, phase, HW tile)
            in_specs=[
                pl.BlockSpec((1, tile_hw, Cp), lambda b, p, t: (b, t, 0)),   # x tile
                pl.BlockSpec((Cp, C4p), lambda b, p, t: (0, 0)),             # w1 (resident)
                pl.BlockSpec((1, C4p), lambda b, p, t: (0, 0)),              # b1
                pl.BlockSpec((C4p, Cp), lambda b, p, t: (0, 0)),             # w2 (resident)
                pl.BlockSpec((1, Cp), lambda b, p, t: (0, 0)),               # b2 + beta@W2
                pl.BlockSpec((1, C4p), lambda b, p, t: (0, 0)),              # gamma
            ],
            # Phase 0 emits nothing; parking the output block index at
            # (b, p*t == 0) keeps one resident, never-flushed-while-unwritten
            # buffer through phase 0, and phase 1 then writes every tile in
            # order.  ASSUMPTION (documented per review): Pallas only writes
            # an output block back to HBM when its block index changes.
            out_specs=pl.BlockSpec((1, tile_hw, Cp), lambda b, p, t: (b, p * t, 0)),
            scratch_shapes=scratch_shapes,
        ),
        compiler_params=pltpu.CompilerParams(
            # TODO(synk): on v7x with B == 1, split the HW-tile axis across the
            # two TensorCores (per-core partial ssq + cross-core combine)
            # instead of relying on the batch axis for megacore parallelism.
            dimension_semantics=("parallel", "arbitrary", "arbitrary"),
            vmem_limit_bytes=vmem_limit,
        ),
    )(x, w1p, b1p, w2p, b2p, gp)

    out = out[:, :HW, :C]
    return jnp.transpose(out.reshape(B, H, W, C), (0, 3, 1, 2))


def _reference(x_nchw, params):
    """Pure-JAX (f32) reference matching the PyTorch forward exactly."""
    w1, b1, w2, b2, gamma, beta = params
    xh = jnp.transpose(x_nchw, (0, 2, 3, 1)).astype(jnp.float32)   # NHWC
    mu = jnp.mean(xh, axis=-1, keepdims=True)
    var = jnp.mean((xh - mu) ** 2, axis=-1, keepdims=True)
    xn = (xh - mu) / jnp.sqrt(var + 1e-6)
    h = xn @ w1 + b1.reshape(1, 1, 1, -1)
    h = 0.5 * h * (1.0 + jax.lax.erf(h / jnp.sqrt(2.0)))
    gx = jnp.sqrt(jnp.sum(h * h, axis=(1, 2), keepdims=True))
    nx = gx / (jnp.mean(gx, axis=-1, keepdims=True) + 1e-6)
    h = gamma.reshape(1, 1, 1, -1) * (h * nx) + beta.reshape(1, 1, 1, -1) + h
    y = h @ w2 + b2.reshape(1, 1, 1, -1)
    return x_nchw + jnp.transpose(y, (0, 3, 1, 2))


if __name__ == "__main__":
    B, C, H, W = 2, 4, 16, 16
    C4 = 4 * C

    key = jax.random.PRNGKey(0)
    k = jax.random.split(key, 7)
    x = jax.random.normal(k[0], (B, C, H, W), dtype=jnp.float32)

    # Deterministic parameter init (Linear.reset_parameters is a no-op in the
    # PyTorch module; gamma/beta are zero-init there but use small random
    # values here so the GRN path is actually exercised).
    w1 = 0.05 * jax.random.normal(k[1], (C, C4), dtype=jnp.float32)
    b1 = 0.05 * jax.random.normal(k[2], (1, C4), dtype=jnp.float32)
    w2 = 0.05 * jax.random.normal(k[3], (C4, C), dtype=jnp.float32)
    b2 = 0.05 * jax.random.normal(k[4], (1, C), dtype=jnp.float32)
    gamma = 0.1 * jax.random.normal(k[5], (1, C4), dtype=jnp.float32)
    beta = 0.1 * jax.random.normal(k[6], (1, C4), dtype=jnp.float32)
    params = (w1, b1, w2, b2, gamma, beta)

    out = jax.block_until_ready(feed_forward_block(x, params))
    ref = jax.block_until_ready(_reference(x, params))

    assert out.shape == (B, C, H, W)
    # bf16 MXU operands + bf16 h-cache (f32 accumulation) -> loosened tolerances.
    np.testing.assert_allclose(np.asarray(out), np.asarray(ref), rtol=5e-3, atol=5e-3)

    print("KERNEL_OK")
</pallas_src>

<mosaic_0001>
module attributes {stable_mosaic.version = 11 : i64} {
  func.func @_ffb_kernel(%arg0: i32, %arg1: i32, %arg2: i32, %arg3: memref<1x256x128xf32, #tpu.memory_space<vmem>>, %arg4: memref<128x128xbf16, #tpu.memory_space<vmem>>, %arg5: memref<1x128xf32, #tpu.memory_space<vmem>>, %arg6: memref<128x128xbf16, #tpu.memory_space<vmem>>, %arg7: memref<1x128xf32, #tpu.memory_space<vmem>>, %arg8: memref<1x128xf32, #tpu.memory_space<vmem>>, %arg9: memref<1x256x128xf32, #tpu.memory_space<vmem>>, %arg10: memref<1x128xf32, #tpu.memory_space<vmem>>, %arg11: memref<1x128xf32, #tpu.memory_space<vmem>>, %arg12: memref<1x256x128xbf16, #tpu.memory_space<vmem>>) attributes {dimension_semantics = [#tpu.dimension_semantics<parallel>, #tpu.dimension_semantics<arbitrary>, #tpu.dimension_semantics<arbitrary>], iteration_bounds = array<i64: 2, 2, 1>, scalar_prefetch = 0 : i64, scratch_operands = 3 : i64, tpu.core_type = #tpu.core_type<tc>, window_params = [{transform_indices = @transform_0, window_bounds = array<i64: 1, 256, 128>}, {pipeline_mode = #tpu.pipeline_mode<synchronous>, transform_indices = @transform_1, window_bounds = array<i64: 128, 128>}, {pipeline_mode = #tpu.pipeline_mode<synchronous>, transform_indices = @transform_2, window_bounds = array<i64: 1, 128>}, {pipeline_mode = #tpu.pipeline_mode<synchronous>, transform_indices = @transform_3, window_bounds = array<i64: 128, 128>}, {pipeline_mode = #tpu.pipeline_mode<synchronous>, transform_indices = @transform_4, window_bounds = array<i64: 1, 128>}, {pipeline_mode = #tpu.pipeline_mode<synchronous>, transform_indices = @transform_5, window_bounds = array<i64: 1, 128>}, {transform_indices = @transform_6, window_bounds = array<i64: 1, 256, 128>}]} {
    %c0_i32 = arith.constant 0 : i32
    %0 = arith.cmpi eq, %arg1, %c0_i32 : i32
    %c0_i32_0 = arith.constant 0 : i32
    %1 = arith.cmpi eq, %arg2, %c0_i32_0 : i32
    %2 = arith.andi %0, %1 : i1
    %3 = arith.extui %2 : i1 to i32
    %c0_i32_1 = arith.constant 0 : i32
    %4 = arith.cmpi ne, %3, %c0_i32_1 : i32
    scf.if %4 {
      %cst = arith.constant 0.000000e+00 : f32
      %16 = vector.broadcast %cst : f32 to vector<1x128xf32>
      %c0 = arith.constant 0 : index
      %c0_8 = arith.constant 0 : index
      %17 = vector.load %arg10[%c0, %c0_8] : memref<1x128xf32, #tpu.memory_space<vmem>>, vector<1x128xf32>
      tpu.vector_store %arg10[%c0, %c0_8], %16 {strides = array<i32>} : memref<1x128xf32, #tpu.memory_space<vmem>>, vector<1x128xf32>,
    } else {
    }
    %c0_i32_2 = arith.constant 0 : i32
    %5 = arith.cmpi eq, %arg1, %c0_i32_2 : i32
    %6 = arith.extui %5 : i1 to i32
    %c0_i32_3 = arith.constant 0 : i32
    %7 = arith.cmpi ne, %6, %c0_i32_3 : i32
    scf.if %7 {
      %c0 = arith.constant 0 : index
      %c0_8 = arith.constant 0 : index
      %c0_9 = arith.constant 0 : index
      %16 = vector.load %arg3[%c0, %c0_8, %c0_9] : memref<1x256x128xf32, #tpu.memory_space<vmem>>, vector<1x256x128xf32>
      %17 = vector.shape_cast %16 : vector<1x256x128xf32> to vector<256x128xf32>
      %cst = arith.constant dense<0.000000e+00> : vector<256xf32>
      %18 = vector.multi_reduction <add>, %17, %cst [1] : vector<256x128xf32> to vector<256xf32>
      %19 = vector.shape_cast %18 : vector<256xf32> to vector<256x1xf32>
      %cst_10 = arith.constant 2.500000e-01 : f32
      %20 = vector.broadcast %cst_10 : f32 to vector<256x1xf32>
      %21 = arith.mulf %19, %20 : vector<256x1xf32>
      %22 = vector.broadcast %21 : vector<256x1xf32> to vector<256x128xf32>
      %23 = arith.subf %17, %22 : vector<256x128xf32>
      %24 = tpu.iota {dimensions = array<i32: 1>} : vector<1x128xi32>
      %c4_i32 = arith.constant 4 : i32
      %25 = vector.broadcast %c4_i32 : i32 to vector<1x128xi32>
      %26 = arith.cmpi slt, %24, %25 : vector<1x128xi32>
      %27 = arith.extui %26 : vector<1x128xi1> to vector<1x128xi32>
      %28 = arith.sitofp %27 : vector<1x128xi32> to vector<1x128xf32>
      %29 = arith.mulf %23, %23 : vector<256x128xf32>
      %30 = vector.broadcast %28 : vector<1x128xf32> to vector<256x128xf32>
      %31 = arith.mulf %29, %30 : vector<256x128xf32>
      %cst_11 = arith.constant dense<0.000000e+00> : vector<256xf32>
      %32 = vector.multi_reduction <add>, %31, %cst_11 [1] : vector<256x128xf32> to vector<256xf32>
      %33 = vector.shape_cast %32 : vector<256xf32> to vector<256x1xf32>
      %cst_12 = arith.constant 2.500000e-01 : f32
      %34 = vector.broadcast %cst_12 : f32 to vector<256x1xf32>
      %35 = arith.mulf %33, %34 : vector<256x1xf32>
      %cst_13 = arith.constant 9.99999997E-7 : f32
      %36 = vector.broadcast %cst_13 : f32 to vector<256x1xf32>
      %37 = arith.addf %35, %36 : vector<256x1xf32>
      %38 = math.rsqrt %37 : vector<256x1xf32>
      %39 = vector.broadcast %38 : vector<256x1xf32> to vector<256x128xf32>
      %40 = arith.mulf %23, %39 : vector<256x128xf32>
      %41 = arith.truncf %40 : vector<256x128xf32> to vector<256x128xbf16>
      %c0_14 = arith.constant 0 : index
      %c0_15 = arith.constant 0 : index
      %42 = vector.load %arg4[%c0_14, %c0_15] : memref<128x128xbf16, #tpu.memory_space<vmem>>, vector<128x128xbf16>
      %cst_16 = arith.constant dense<0.000000e+00> : vector<256x128xf32>
      %43 = tpu.matmul %41, %42, %cst_16 {dimension_numbers = #tpu.dot_dimension_numbers<[1], [0], [0], [1], [0, 0, 1, 1], [], []>} : vector<256x128xbf16>, vector<128x128xbf16>, vector<256x128xf32> -> vector<256x128xf32>
      %c0_17 = arith.constant 0 : index
      %c0_18 = arith.constant 0 : index
      %44 = vector.load %arg5[%c0_17, %c0_18] : memref<1x128xf32, #tpu.memory_space<vmem>>, vector<1x128xf32>
      %45 = vector.broadcast %44 : vector<1x128xf32> to vector<256x128xf32>
      %46 = arith.addf %43, %45 : vector<256x128xf32>
      %cst_19 = arith.constant 5.000000e-01 : f32
      %47 = vector.broadcast %cst_19 : f32 to vector<256x128xf32>
      %48 = arith.mulf %47, %46 : vector<256x128xf32>
      %cst_20 = arith.constant 0.707106769 : f32
      %49 = vector.broadcast %cst_20 : f32 to vector<256x128xf32>
      %50 = arith.mulf %46, %49 : vector<256x128xf32>
      %51 = math.erf %50 : vector<256x128xf32>
      %cst_21 = arith.constant 1.000000e+00 : f32
      %52 = vector.broadcast %cst_21 : f32 to vector<256x128xf32>
      %53 = arith.addf %52, %51 : vector<256x128xf32>
      %54 = arith.mulf %48, %53 : vector<256x128xf32>
      %55 = arith.truncf %54 : vector<256x128xf32> to vector<256x128xbf16>
      %56 = arith.index_cast %arg2 : i32 to index
      %c0_22 = arith.constant 0 : index
      %c0_23 = arith.constant 0 : index
      %57 = vector.load %arg12[%56, %c0_22, %c0_23] : memref<1x256x128xbf16, #tpu.memory_space<vmem>>, vector<1x256x128xbf16>
      %58 = vector.shape_cast %57 : vector<1x256x128xbf16> to vector<256x128xbf16>
      %59 = vector.shape_cast %55 : vector<256x128xbf16> to vector<1x256x128xbf16>
      tpu.vector_store %arg12[%56, %c0_22, %c0_23], %59 {strides = array<i32>} : memref<1x256x128xbf16, #tpu.memory_space<vmem>>, vector<1x256x128xbf16>,
      %60 = arith.mulf %54, %54 : vector<256x128xf32>
      %c0_24 = arith.constant 0 : index
      %c0_25 = arith.constant 0 : index
      %61 = vector.load %arg10[%c0_24, %c0_25] : memref<1x128xf32, #tpu.memory_space<vmem>>, vector<1x128xf32>
      %cst_26 = arith.constant dense<0.000000e+00> : vector<128xf32>
      %62 = vector.multi_reduction <add>, %60, %cst_26 [0] : vector<256x128xf32> to vector<128xf32>
      %63 = vector.shape_cast %62 : vector<128xf32> to vector<1x128xf32>
      %64 = arith.addf %61, %63 : vector<1x128xf32>
      %c0_27 = arith.constant 0 : index
      %c0_28 = arith.constant 0 : index
      %65 = vector.load %arg10[%c0_27, %c0_28] : memref<1x128xf32, #tpu.memory_space<vmem>>, vector<1x128xf32>
      tpu.vector_store %arg10[%c0_27, %c0_28], %64 {strides = array<i32>} : memref<1x128xf32, #tpu.memory_space<vmem>>, vector<1x128xf32>,
    } else {
    }
    %c1_i32 = arith.constant 1 : i32
    %8 = arith.cmpi eq, %arg1, %c1_i32 : i32
    %c0_i32_4 = arith.constant 0 : i32
    %9 = arith.cmpi eq, %arg2, %c0_i32_4 : i32
    %10 = arith.andi %8, %9 : i1
    %11 = arith.extui %10 : i1 to i32
    %c0_i32_5 = arith.constant 0 : i32
    %12 = arith.cmpi ne, %11, %c0_i32_5 : i32
    scf.if %12 {
      %c0 = arith.constant 0 : index
      %c0_8 = arith.constant 0 : index
      %16 = vector.load %arg10[%c0, %c0_8] : memref<1x128xf32, #tpu.memory_space<vmem>>, vector<1x128xf32>
      %17 = math.sqrt %16 : vector<1x128xf32>
      %cst = arith.constant dense<0.000000e+00> : vector<1xf32>
      %18 = vector.multi_reduction <add>, %17, %cst [1] : vector<1x128xf32> to vector<1xf32>
      %19 = vector.shape_cast %18 : vector<1xf32> to vector<1x1xf32>
      %cst_9 = arith.constant 6.250000e-02 : f32
      %20 = vector.broadcast %cst_9 : f32 to vector<1x1xf32>
      %21 = arith.mulf %19, %20 : vector<1x1xf32>
      %cst_10 = arith.constant 9.99999997E-7 : f32
      %22 = vector.broadcast %cst_10 : f32 to vector<1x1xf32>
      %23 = arith.addf %21, %22 : vector<1x1xf32>
      %c0_11 = arith.constant 0 : index
      %c0_12 = arith.constant 0 : index
      %24 = vector.load %arg8[%c0_11, %c0_12] : memref<1x128xf32, #tpu.memory_space<vmem>>, vector<1x128xf32>
      %25 = vector.broadcast %23 : vector<1x1xf32> to vector<1x128xf32>
      %26 = arith.divf %17, %25 : vector<1x128xf32>
      %27 = arith.mulf %24, %26 : vector<1x128xf32>
      %cst_13 = arith.constant 1.000000e+00 : f32
      %28 = vector.broadcast %cst_13 : f32 to vector<1x128xf32>
      %29 = arith.addf %27, %28 : vector<1x128xf32>
      %c0_14 = arith.constant 0 : index
      %c0_15 = arith.constant 0 : index
      %30 = vector.load %arg11[%c0_14, %c0_15] : memref<1x128xf32, #tpu.memory_space<vmem>>, vector<1x128xf32>
      tpu.vector_store %arg11[%c0_14, %c0_15], %29 {strides = array<i32>} : memref<1x128xf32, #tpu.memory_space<vmem>>, vector<1x128xf32>,
    } else {
    }
    %c1_i32_6 = arith.constant 1 : i32
    %13 = arith.cmpi eq, %arg1, %c1_i32_6 : i32
    %14 = arith.extui %13 : i1 to i32
    %c0_i32_7 = arith.constant 0 : i32
    %15 = arith.cmpi ne, %14, %c0_i32_7 : i32
    scf.if %15 {
      %16 = arith.index_cast %arg2 : i32 to index
      %c0 = arith.constant 0 : index
      %c0_8 = arith.constant 0 : index
      %17 = vector.load %arg12[%16, %c0, %c0_8] : memref<1x256x128xbf16, #tpu.memory_space<vmem>>, vector<1x256x128xbf16>
      %18 = vector.shape_cast %17 : vector<1x256x128xbf16> to vector<256x128xbf16>
      %c0_9 = arith.constant 0 : index
      %c0_10 = arith.constant 0 : index
      %19 = vector.load %arg11[%c0_9, %c0_10] : memref<1x128xf32, #tpu.memory_space<vmem>>, vector<1x128xf32>
      %20 = arith.extf %18 : vector<256x128xbf16> to vector<256x128xf32>
      %21 = vector.broadcast %19 : vector<1x128xf32> to vector<256x128xf32>
      %22 = arith.mulf %20, %21 : vector<256x128xf32>
      %23 = arith.truncf %22 : vector<256x128xf32> to vector<256x128xbf16>
      %c0_11 = arith.constant 0 : index
      %c0_12 = arith.constant 0 : index
      %24 = vector.load %arg6[%c0_11, %c0_12] : memref<128x128xbf16, #tpu.memory_space<vmem>>, vector<128x128xbf16>
      %cst = arith.constant dense<0.000000e+00> : vector<256x128xf32>
      %25 = tpu.matmul %23, %24, %cst {dimension_numbers = #tpu.dot_dimension_numbers<[1], [0], [0], [1], [0, 0, 1, 1], [], []>} : vector<256x128xbf16>, vector<128x128xbf16>, vector<256x128xf32> -> vector<256x128xf32>
      %c0_13 = arith.constant 0 : index
      %c0_14 = arith.constant 0 : index
      %26 = vector.load %arg7[%c0_13, %c0_14] : memref<1x128xf32, #tpu.memory_space<vmem>>, vector<1x128xf32>
      %27 = vector.broadcast %26 : vector<1x128xf32> to vector<256x128xf32>
      %28 = arith.addf %25, %27 : vector<256x128xf32>
      %c0_15 = arith.constant 0 : index
      %c0_16 = arith.constant 0 : index
      %c0_17 = arith.constant 0 : index
      %29 = vector.load %arg3[%c0_15, %c0_16, %c0_17] : memref<1x256x128xf32, #tpu.memory_space<vmem>>, vector<1x256x128xf32>
      %30 = vector.shape_cast %29 : vector<1x256x128xf32> to vector<256x128xf32>
      %31 = arith.addf %30, %28 : vector<256x128xf32>
      %c0_18 = arith.constant 0 : index
      %c0_19 = arith.constant 0 : index
      %c0_20 = arith.constant 0 : index
      %32 = vector.load %arg9[%c0_18, %c0_19, %c0_20] : memref<1x256x128xf32, #tpu.memory_space<vmem>>, vector<1x256x128xf32>
      %33 = vector.shape_cast %32 : vector<1x256x128xf32> to vector<256x128xf32>
      %34 = vector.shape_cast %31 : vector<256x128xf32> to vector<1x256x128xf32>
      tpu.vector_store %arg9[%c0_18, %c0_19, %c0_20], %34 {strides = array<i32>} : memref<1x256x128xf32, #tpu.memory_space<vmem>>, vector<1x256x128xf32>,
    } else {
    }
    return
  }
  func.func @transform_0(%arg0: i32, %arg1: i32, %arg2: i32) -> (i32, i32, i32) {
    %c0_i32 = arith.constant 0 : i32
    %c0_i32_0 = arith.constant 0 : i32
    return %arg0, %arg2, %c0_i32 : i32, i32, i32
  }
  func.func @transform_1(%arg0: i32, %arg1: i32, %arg2: i32) -> (i32, i32) {
    %c0_i32 = arith.constant 0 : i32
    %c0_i32_0 = arith.constant 0 : i32
    %c0_i32_1 = arith.constant 0 : i32
    return %c0_i32, %c0_i32_0 : i32, i32
  }
  func.func @transform_2(%arg0: i32, %arg1: i32, %arg2: i32) -> (i32, i32) {
    %c0_i32 = arith.constant 0 : i32
    %c0_i32_0 = arith.constant 0 : i32
    %c0_i32_1 = arith.constant 0 : i32
    return %c0_i32, %c0_i32_0 : i32, i32
  }
  func.func @transform_3(%arg0: i32, %arg1: i32, %arg2: i32) -> (i32, i32) {
    %c0_i32 = arith.constant 0 : i32
    %c0_i32_0 = arith.constant 0 : i32
    %c0_i32_1 = arith.constant 0 : i32
    return %c0_i32, %c0_i32_0 : i32, i32
  }
  func.func @transform_4(%arg0: i32, %arg1: i32, %arg2: i32) -> (i32, i32) {
    %c0_i32 = arith.constant 0 : i32
    %c0_i32_0 = arith.constant 0 : i32
    %c0_i32_1 = arith.constant 0 : i32
    return %c0_i32, %c0_i32_0 : i32, i32
  }
  func.func @transform_5(%arg0: i32, %arg1: i32, %arg2: i32) -> (i32, i32) {
    %c0_i32 = arith.constant 0 : i32
    %c0_i32_0 = arith.constant 0 : i32
    %c0_i32_1 = arith.constant 0 : i32
    return %c0_i32, %c0_i32_0 : i32, i32
  }
  func.func @transform_6(%arg0: i32, %arg1: i32, %arg2: i32) -> (i32, i32, i32) {
    %0 = arith.muli %arg1, %arg2 : i32
    %c0_i32 = arith.constant 0 : i32
    %c0_i32_0 = arith.constant 0 : i32
    return %arg0, %0, %c0_i32 : i32, i32, i32
  }
}

</mosaic_0001>

<bundles_post_ra>
// kernel: tpu_custom_call.1
= control target key start
LH: loop header
LB: loop body
LE: loop exit
PB: predicated region body
PF: predicated region fallthrough
CT: control target
= control target key end

     0   :  { %s3796_s0 = inlined_call_operand.hbm [shape: f32[2,256,128], index: 0, kind: input, shape index: {}]   ;;  %s3797_s1 = inlined_call_operand.hbm [shape: bf16[128,128], index: 1, kind: input, shape index: {}]   ;;  %s3798_s2 = inlined_call_operand.vmem [shape: f32[1,128], index: 2, kind: input, shape index: {}]   ;;  %s3799_s3 = inlined_call_operand.hbm [shape: bf16[128,128], index: 3, kind: input, shape index: {}]   ;;  %s3800_s4 = inlined_call_operand.vmem [shape: f32[1,128], index: 4, kind: input, shape index: {}]   ;;  %s3801_s5 = inlined_call_operand.vmem [shape: f32[1,128], index: 5, kind: input, shape index: {}]   ;;  %s3802_s6 = inlined_call_operand.hbm [shape: f32[2,256,128], index: 6, kind: output, shape index: {}]  }
   0x1   :  { %3809 = sst [smem:[#allocation19_spill]] %s3797_s1 }
   0x2   :  { %3810 = sst [smem:[#allocation20_spill]] %s3799_s3 }
   0x3   :  { %11 = vsyncpa [#allocation6], 0 }
   0x4   :  { %13 = vsyncpa [#allocation6 + $0x1], 0 }
   0x5   :  { %14 = vsyncpa [#allocation9], 0 }
   0x6   :  { %15 = vsyncpa [#allocation7], 0 }
   0x7   :  { %17 = vsyncpa [#allocation7 + $0x1], 0  ;;  %s2960_s21 = smov 0   ;;  %s2962_s22 = smov 0  }
   0x8   :  { %s2964_s23 = smov 0   ;;  %s2966_s24 = smov 0  }
   0x9   :  { %s2968_s25 = smov 0   ;;  %s2970_s26 = smov 0  }
   0xa   :  { %s2972_s27 = smov 0   ;;  %s2974_s28 = smov 0  }
   0xb LB: > { %3811 = sst [smem:[#allocation15_spill]] %s2903_s26  ;;  %s2015_s29 = sadd.s32 4294967295, %s2911_s28   ;;  %s2911_s28 = sphi %s2974_s28, %s23_s28   ;;  %s2907_s27 = sphi %s2972_s27, %s3838_s27   ;;  %s2903_s26 = sphi %s2970_s26, %s3837_s26   ;;  %s2899_s25 = sphi %s2968_s25, %s3836_s25   ;;  %s2895_s24 = sphi %s2966_s24, %s3830_s24   ;;  %s2891_s23 = sphi %s2964_s23, %s3835_s23   ;;  %s2887_s22 = sphi %s2962_s22, %s3834_s22   ;;  %s2883_s21 = sphi %s2960_s21, %s3833_s21  }
   0xc   : > { %s2016_s30 = sadd.s32 4294967294, %s2911_s28   ;;  %p64_p0 = scmp.ne.s32.totalorder %s2887_s22, %s2883_s21 }
   0xd   : > { %p3004_p1 = scmp.eq.s32.totalorder %s2015_s29, 0  ;;  %p3008_p2 = scmp.eq.s32.totalorder %s2015_s29, 3 }
   0xe   : > { %p203_p3 = scmp.eq.s32.totalorder %s2016_s30, 3  ;;  %p2017_p5 = scmp.ge.s32.totalorder %s2911_s28, 1 }
   0xf   : > { %s3812_s7 = scalar_select %p3004_p1, 1, 0 }
  0x10   : > { %p3014_p4 = por %p3004_p1, %p64_p0  ;;  %p3019_p6 = por %p203_p3, %p64_p0 }
  0x11   : > { %p210_p7 = scmp.lt.s32.totalorder %s2911_s28, 5  ;;  %s2913_s12 = smov [#allocation8]  }
  0x12   : > { %s3814_s9 = scalar_select %p3014_p4, 1, 0 }
  0x13   : > { %s3815_s10 = scalar_select %p3019_p6, 1, 0 }
  0x14   : > { %p3024_p8 = pnand %p2017_p5, %p210_p7  ;;  %s222_s13 = sshll.u32 %s2913_s12, 4  ;;  %s223_s13 = int_to_ptr.vmem [resolvable:$true] %s222_s13 }
  0x15   : > { %3816 = sst [smem:[#allocation16_spill]] %s3815_s10  ;;  %s2914_s15 = smov [#allocation10]  }
  0x16   : > { %p2488_p9 = pneg %p3024_p8  ;;  %s238_s16 = sshll.u32 %s2914_s15, 4  ;;  %s239_s16 = int_to_ptr.vmem [resolvable:$true] %s238_s16 }
  0x17   : > { %s2742_s17 = scalar_lea.vmem %s223_s13, 1024  ;;  %p2750_p3 = scmp.lt.s32.totalorder %s223_s13, %s223_s13 }
  0x18   : > { %p3032_p10 = pnand %p2488_p9, %p3004_p1  ;;  %p2743_p12 = scmp.ne.s32.totalorder %s223_s13, %s2742_s17 }
  0x19   : > { %p2751_p5 = scmp.lt.s32.totalorder %s2742_s17, %s2742_s17 }
  0x1a   : > { %p2733_p11 = pneg %p3032_p10 }
  0x1b   : > { %p2752_p7 = por %p2751_p5, %p2750_p3 }
  0x1c   : > { %p2745_p13 = pnand %p2743_p12, %p2733_p11 }
  0x1e   : > { %p2746_p0 = pneg %p2745_p13 }
  0x20   : > { %p2753_p9 = pnand %p2752_p7, %p2746_p0 }
  0x22   : > { %2756 = shalt.err (!%p2753_p9)
}
  0x23   : > { %s2915_s18 = smov 64   ;;  %s2916_s19 = smov 4  }
  0x24   : > { %s3819_s1 = sld [smem:[#allocation19_spill]]  ;;  %s2768_s30 = scalar_lea.vmem %s239_s16, 1024 }
  0x25   : > { %p2769_p6 = scmp.ne.s32.totalorder %s239_s16, %s2768_s30  ;;  %p2776_p1 = scmp.lt.s32.totalorder %s239_s16, %s239_s16 }
  0x26   : > { %p2777_p4 = scmp.lt.s32.totalorder %s2768_s30, %s2768_s30 }
  0x27   : > { %p2771_p12 = pnand %p2769_p6, %p2733_p11 }
  0x28   : > { %p2778_p3 = por %p2777_p4, %p2776_p1 }
  0x29   : > { %p2772_p13 = pneg %p2771_p12 }
  0x2a   : > { %2491 = dma.hbm_to_vmem [thread:$0]  (!%p3032_p10), %s3819_s1, 1024, %s223_s13, [#allocation9], %s2915_s18, %s2915_s18, %s2916_s19  }
  0x2b   : > { %p2779_p0 = pnand %p2778_p3, %p2772_p13 }
  0x2d   : > { %2782 = shalt.err (!%p2779_p0)
}
  0x2e   : > { %s3820_s3 = sld [smem:[#allocation20_spill]]  ;;  %s38_s13 = sadd.s32 1, %s2903_s26 }
  0x2f   : > { %s42_s17 = sadd.s32 1, %s2907_s27  ;;  %p40_p1 = scmp.ge.s32.totalorder %s38_s13, 2 }
  0x30   : > { %s51_s14 = sadd.s32 1, %s2891_s23  ;;  %p58_p4 = scmp.ne.s32.totalorder %s2891_s23, %s2887_s22 }
  0x31   : > { %p59_p6 = scmp.eq.s32.totalorder %s2911_s28, 0  ;;  %s3840_s13 = smov (%p40_p1, %s38_s13), 0 }
  0x32   : > { %3821 = sst [smem:[#allocation17_spill]] %s3840_s13  ;;  %s3842_s17 = smov (!%p40_p1, %s42_s17), %s2907_s27 }
  0x33   : > { %p3063_p11 = por %p59_p6, %p58_p4  ;;  %p3069_p5 = por %p3008_p2, %p58_p4 }
  0x34   : > { %2494 = dma.hbm_to_vmem [thread:$0]  (!%p3032_p10), %s3820_s3, 1024, %s239_s16, [#allocation9], %s2915_s18, %s2915_s18, %s2916_s19  }
  0x35   : > { %p44_p10 = scmp.ge.s32.totalorder %s3842_s17, 2  ;;  %p2505_p7 = scmp.lt.s32.totalorder %s2911_s28, 4 }
  0x36   : > { %s258_s16 = sand.u32 1, %s2891_s23   ;;  %s2090_s18 = sshll.u32 %s2907_s27, 12 }
  0x37   : > { %s3844_s17 = smov (%p44_p10, %s3842_s17), 0  ;;  %s2021_s19 = sshll.u32 %s258_s16, 8 }
  0x38   : > { %3824 = sst [smem:[#allocation18_spill]] %s3844_s17  ;;  %s46_s30 = ssub.s32 %s2907_s27, %s3844_s17 }
  0x39   : > { %p49_p9 = scmp.eq.s32.totalorder %s46_s30, 0  ;;  %s270_s1 = scalar_lea.hbm %s3796_s0, %s2090_s18 }
  0x3a   : > { %s262_s8 = scalar_lea.vmem [#allocation5], %s2021_s19  ;;  %p3085_p2 = pnand %p2505_p7, %p3063_p11 }
  0x3b   : > { %s271_s3 = sshll.u32 %s262_s8, 4  ;;  %s259_s10 = scalar_lea.sflag [#allocation6], %s258_s16  ;;  %s272_s3 = int_to_ptr.vmem [resolvable:$true] %s271_s3 }
  0x3c   : > { %s3090_s26 = scalar_select %p49_p9, %s2891_s23, %s51_s14  }
  0x3d   : > { %p2785_p12 = pneg %p3085_p2  ;;  %s2796_s17 = scalar_lea.vmem %s272_s3, 4096 }
  0x3e   : > { %p2797_p13 = scmp.ne.s32.totalorder %s272_s3, %s2796_s17  ;;  %s2917_s30 = smov [#allocation5]  }
  0x3f   : > { %s2801_s18 = sshll.u32 %s2917_s30, 4  ;;  %s2802_s18 = int_to_ptr.vmem [resolvable:$false] %s2801_s18 }
  0x40   : > { %p2799_p3 = pnand %p2797_p13, %p2785_p12  ;;  %s2803_s19 = scalar_lea.vmem %s2802_s18, 8192 }
  0x41   : > { %p2804_p1 = scmp.lt.s32.totalorder %s272_s3, %s2802_s18  ;;  %p2805_p4 = scmp.lt.s32.totalorder %s2803_s19, %s2796_s17 }
  0x42   : > { %p2800_p0 = pneg %p2799_p3 }
  0x43   : > { %p2806_p6 = por %p2805_p4, %p2804_p1 }
  0x45   : > { %p2807_p11 = pnand %p2806_p6, %p2800_p0 }
  0x47   : > { %2810 = shalt.err (!%p2807_p11)
}
  0x48   : > { %s2918_s20 = smov 128   ;;  %s2919_s14 = smov 8  }
  0x49   : > { %2498 = dma.hbm_to_vmem [thread:$0]  (!%p3085_p2), %s270_s1, 4096, %s272_s3, %s259_s10, %s2918_s20, %s2918_s20, %s2919_s14  }
  0x4a   : > { %283 = sbr.rel (%p3024_p8) target bundleno = 1195 (0x4ab), region = 44  ;;  %s3099_s16 = sand.u32 (!%p3024_p8), 1, %s2887_s22  }
  0x4b   : > { %s2025_s12 = sshll.u32 (!%p3024_p8), %s3099_s16, 8  ;;  %s286_s15 = scalar_lea.sflag (!%p3024_p8), [#allocation6], %s3099_s16 }
  0x4c   : > { %s3103_s17 = scalar_lea.vmem (!%p3024_p8), [#allocation5], %s2025_s12  ;;  %p3826_p10 = scmp.ne.s32.totalorder (!%p3024_p8), %s3814_s9, 0 }
  0x4f   : > { %2870 = dma.done.wait (%p3826_p10), %s286_s15, 4096  }
  0x50   : > { %2872 = vsyncadd (%p3826_p10), %s286_s15, 4294963200  ;;  %p3827_p7 = scmp.ne.s32.totalorder %s3812_s7, 0 }
  0x52   : > { %2874 = dma.done.wait (%p3827_p7), [#allocation9], 2048  }
  0x53   : > { %2876 = vsyncadd (%p3827_p7), [#allocation9], 4294965248  ;;  %p330_p8 = scmp.eq.s32.totalorder %s2895_s24, 0  ;;  %s3114_s1 = scalar_lea.vmem [#allocation11], %s2025_s12 }
  0x54   : > { %v2920_v0 = vmov (%p330_p8), 0.0  }
  0x55   : > { %335 = sbr.rel (!%p330_p8) target bundleno = 90 (0x5a), region = 60  ;;  %336 = vst [vmem:[#allocation2] sm:$0x1] (%p330_p8), %v2920_v0 }
  0x5a PF: > { %p2030_p9 = scmp.ne.s32.totalorder %s2895_s24, 0 }
  0x5c   : > { %339 = sbr.rel (%p2030_p9) target bundleno = 714 (0x2ca), region = 64 }
  0x61   : > { %v3118_v1 = vld [vmem:[%s3103_s17] sm:$0xff]  ;;  %v3121_v2 = vld [vmem:[%s3103_s17 + $0x10] sm:$0xff]  ;;  %v3126_v3 = vld [vmem:[%s3103_s17 + $0x8] sm:$0xff]  ;;  %v500_v34 = vlaneseq  ;;  %v2921_v44 = vmov 0.0  }
  0x62   : > { %372 = vadd.xlane.f32.xlu0 %v3118_v1  ;;  %376 = vadd.xlane.f32.xlu1 %v3121_v2  ;;  %v3129_v4 = vld [vmem:[%s3103_s17 + $0x18] sm:$0xff]  ;;  %v3134_v5 = vld [vmem:[%s3103_s17 + $0x20] sm:$0xff]  ;;  %v3137_v6 = vld [vmem:[%s3103_s17 + $0x28] sm:$0xff] }
  0x63   : > { %v3142_v7 = vld [vmem:[%s3103_s17 + $0x30] sm:$0xff]  ;;  %v3145_v8 = vld [vmem:[%s3103_s17 + $0x38] sm:$0xff]  ;;  %v3148_v9 = vld [vmem:[%s3103_s17 + $0x40] sm:$0xff]  ;;  %v501_v35 = vand.u32 127, %v500_v34 }
  0x64   : > { %v3153_v10 = vld [vmem:[%s3103_s17 + $0x48] sm:$0xff]  ;;  %v3158_v11 = vld [vmem:[%s3103_s17 + $0x50] sm:$0xff]  ;;  %v3161_v12 = vld [vmem:[%s3103_s17 + $0x58] sm:$0xff] }
  0x65   : > { %v3166_v13 = vld [vmem:[%s3103_s17 + $0x60] sm:$0xff]  ;;  %v3169_v14 = vld [vmem:[%s3103_s17 + $0x68] sm:$0xff]  ;;  %v3174_v15 = vld [vmem:[%s3103_s17 + $0x70] sm:$0xff]  ;;  %vm502_vm0 = vcmp.lt.s32.totalorder %v501_v35, 4 }
  0x66   : > { %374 = vadd.xlane.f32.xlu0 %v3126_v3  ;;  %378 = vadd.xlane.f32.xlu1 %v3129_v4  ;;  %v3177_v16 = vld [vmem:[%s3103_s17 + $0x78] sm:$0xff]  ;;  %v3182_v17 = vld [vmem:[%s3103_s17 + $0x80] sm:$0xff]  ;;  %v3185_v18 = vld [vmem:[%s3103_s17 + $0x88] sm:$0xff]  ;;  %v3251_v45 = vsel %vm502_vm0, 1.0, %v2921_v44 }
  0x67   : > { %v3190_v19 = vld [vmem:[%s3103_s17 + $0x90] sm:$0xff]  ;;  %v3193_v20 = vld [vmem:[%s3103_s17 + $0x98] sm:$0xff]  ;;  %v3198_v21 = vld [vmem:[%s3103_s17 + $0xa0] sm:$0xff] }
  0x68   : > { %v3201_v22 = vld [vmem:[%s3103_s17 + $0xa8] sm:$0xff]  ;;  %v3206_v23 = vld [vmem:[%s3103_s17 + $0xb0] sm:$0xff]  ;;  %v3209_v24 = vld [vmem:[%s3103_s17 + $0xb8] sm:$0xff] }
  0x69   : > { %v3214_v25 = vld [vmem:[%s3103_s17 + $0xc0] sm:$0xff]  ;;  %v3217_v26 = vld [vmem:[%s3103_s17 + $0xc8] sm:$0xff]  ;;  %v3222_v27 = vld [vmem:[%s3103_s17 + $0xd0] sm:$0xff] }
  0x6a   : > { %380 = vadd.xlane.f32.xlu0 %v3134_v5  ;;  %382 = vadd.xlane.f32.xlu1 %v3137_v6  ;;  %v3225_v28 = vld [vmem:[%s3103_s17 + $0xd8] sm:$0xff]  ;;  %v3230_v29 = vld [vmem:[%s3103_s17 + $0xe0] sm:$0xff]  ;;  %v3233_v30 = vld [vmem:[%s3103_s17 + $0xe8] sm:$0xff] }
  0x6b   : > { %v3238_v31 = vld [vmem:[%s3103_s17 + $0xf0] sm:$0xff]  ;;  %v3241_v32 = vld [vmem:[%s3103_s17 + $0xf8] sm:$0xff] }
  0x6c   : > { %v2583_v33 = vld [vmem:[#allocation8 + $0x38] sm:$0xff]  }
  0x6d   : > { %2348 = vmatprep.subr.bf16.mxu0 %v2583_v33  ;;  %2444 = vmatprep.subr.bf16.mxu1 %v2583_v33 }
  0x6e   : > { %384 = vadd.xlane.f32.xlu0 %v3142_v7  ;;  %386 = vadd.xlane.f32.xlu1 %v3145_v8 }
  0x6f   : > { %2349 = vmatpush3.bf16.msra.mxu0 %v2583_v33  ;;  %2452 = vmatpush3.bf16.msra.mxu1 %v2583_v33 }
  0x72   : > { %388 = vadd.xlane.f32.xlu0 %v3148_v9  ;;  %390 = vadd.xlane.f32.xlu1 %v3153_v10 }
  0x76   : > { %392 = vadd.xlane.f32.xlu0 %v3158_v11  ;;  %394 = vadd.xlane.f32.xlu1 %v3161_v12 }
  0x7a   : > { %396 = vadd.xlane.f32.xlu0 %v3166_v13  ;;  %398 = vadd.xlane.f32.xlu1 %v3169_v14 }
  0x7e   : > { %400 = vadd.xlane.f32.xlu0 %v3174_v15  ;;  %402 = vadd.xlane.f32.xlu1 %v3177_v16 }
  0x82   : > { %404 = vadd.xlane.f32.xlu0 %v3182_v17  ;;  %406 = vadd.xlane.f32.xlu1 %v3185_v18 }
  0x86   : > { %408 = vadd.xlane.f32.xlu0 %v3190_v19  ;;  %410 = vadd.xlane.f32.xlu1 %v3193_v20 }
  0x8a   : > { %412 = vadd.xlane.f32.xlu0 %v3198_v21  ;;  %414 = vadd.xlane.f32.xlu1 %v3201_v22 }
  0x8e   : > { %416 = vadd.xlane.f32.xlu0 %v3206_v23  ;;  %418 = vadd.xlane.f32.xlu1 %v3209_v24 }
  0x92   : > { %420 = vadd.xlane.f32.xlu0 %v3214_v25  ;;  %422 = vadd.xlane.f32.xlu1 %v3217_v26 }
  0x96   : > { %424 = vadd.xlane.f32.xlu0 %v3222_v27  ;;  %426 = vadd.xlane.f32.xlu1 %v3225_v28 }
  0x9a   : > { %428 = vadd.xlane.f32.xlu0 %v3230_v29  ;;  %430 = vadd.xlane.f32.xlu1 %v3233_v30 }
  0x9e   : > { %432 = vadd.xlane.f32.xlu0 %v3238_v31  ;;  %434 = vadd.xlane.f32.xlu1 %v3241_v32 }
  0xeb   : > { %v373_v36 = vpop.xlane.xlu0 %372  ;;  %v377_v37 = vpop.xlane.xlu1 %376 }
  0xec   : > { %v436_v38 = vmul.f32 0.25, %v373_v36  ;;  %v438_v39 = vmul.f32 0.25, %v377_v37 }
  0xee   : > { %v3246_v40 = vsub.f32 %v3118_v1, %v436_v38  ;;  %v3249_v41 = vsub.f32 %v3121_v2, %v438_v39 }
  0xef   : > { %v375_v42 = vpop.xlane.xlu0 %374  ;;  %v379_v43 = vpop.xlane.xlu1 %378 }
  0xf0   : > { %v437_v46 = vmul.f32 0.25, %v375_v42  ;;  %v439_v47 = vmul.f32 0.25, %v379_v43  ;;  %v505_v48 = vmul.f32 %v3246_v40, %v3246_v40  ;;  %v507_v49 = vmul.f32 %v3249_v41, %v3249_v41 }
  0xf2   : > { %v3258_v50 = vsub.f32 %v3126_v3, %v437_v46  ;;  %v3261_v51 = vsub.f32 %v3129_v4, %v439_v47  ;;  %v537_v52 = vmul.f32 %v3251_v45, %v505_v48  ;;  %v539_v55 = vmul.f32 %v3251_v45, %v507_v49  ;;  %v2584_v46 = vld [vmem:[#allocation8 + $0x30] sm:$0xff]  }
  0xf3   : > { %v381_v53 = vpop.xlane.xlu0 %380  ;;  %v383_v54 = vpop.xlane.xlu1 %382  ;;  %2350 = vmatprep.subr.bf16.mxu0 %v2584_v46  ;;  %2445 = vmatprep.subr.bf16.mxu1 %v2584_v46 }
  0xf4   : > { %v440_v56 = vmul.f32 0.25, %v381_v53  ;;  %569 = vadd.xlane.f32.xlu0 %v537_v52  ;;  %v441_v57 = vmul.f32 0.25, %v383_v54  ;;  %v506_v58 = vmul.f32 %v3258_v50, %v3258_v50  ;;  %v508_v59 = vmul.f32 %v3261_v51, %v3261_v51  ;;  %2351 = vmatpush3.bf16.msra.mxu0 %v2584_v46 }
  0xf5   : > { %2453 = vmatpush3.bf16.msra.mxu1 %v2584_v46 }
  0xf6   : > { %v3270_v60 = vsub.f32 %v3134_v5, %v440_v56  ;;  %v3273_v61 = vsub.f32 %v3137_v6, %v441_v57  ;;  %v538_v62 = vmul.f32 %v3251_v45, %v506_v58  ;;  %v540_v1 = vmul.f32 %v3251_v45, %v508_v59 }
  0xf7   : > { %v385_v63 = vpop.xlane.xlu0 %384  ;;  %v387_v0 = vpop.xlane.xlu1 %386 }
  0xf8   : > { %v442_v2 = vmul.f32 0.25, %v385_v63  ;;  %573 = vadd.xlane.f32.xlu0 %v539_v55  ;;  %571 = vadd.xlane.f32.xlu1 %v538_v62  ;;  %v443_v3 = vmul.f32 0.25, %v387_v0  ;;  %v509_v4 = vmul.f32 %v3270_v60, %v3270_v60  ;;  %v510_v5 = vmul.f32 %v3273_v61, %v3273_v61  ;;  %v2585_v62 = vld [vmem:[#allocation8 + $0x28] sm:$0xff]  }
  0xf9   : > { %2352 = vmatprep.subr.bf16.mxu0 %v2585_v62  ;;  %2446 = vmatprep.subr.bf16.mxu1 %v2585_v62 }
  0xfa   : > { %v3282_v33 = vsub.f32 %v3142_v7, %v442_v2  ;;  %v3285_v6 = vsub.f32 %v3145_v8, %v443_v3  ;;  %v541_v34 = vmul.f32 %v3251_v45, %v509_v4  ;;  %v542_v37 = vmul.f32 %v3251_v45, %v510_v5  ;;  %2353 = vmatpush3.bf16.msra.mxu0 %v2585_v62 }
  0xfb   : > { %v389_v35 = vpop.xlane.xlu0 %388  ;;  %v391_v36 = vpop.xlane.xlu1 %390  ;;  %2454 = vmatpush3.bf16.msra.mxu1 %v2585_v62 }
  0xfc   : > { %v444_v38 = vmul.f32 0.25, %v389_v35  ;;  %575 = vadd.xlane.f32.xlu1 %v540_v1  ;;  %577 = vadd.xlane.f32.xlu0 %v541_v34  ;;  %v445_v39 = vmul.f32 0.25, %v391_v36  ;;  %v511_v42 = vmul.f32 %v3282_v33, %v3282_v33  ;;  %v512_v7 = vmul.f32 %v3285_v6, %v3285_v6  ;;  %v2586_v35 = vld [vmem:[#allocation8 + $0x20] sm:$0xff]  }
  0xfd   : > { %2354 = vmatprep.subr.bf16.mxu0 %v2586_v35  ;;  %2447 = vmatprep.subr.bf16.mxu1 %v2586_v35 }
  0xfe   : > { %v3294_v43 = vsub.f32 %v3148_v9, %v444_v38  ;;  %v3297_v8 = vsub.f32 %v3153_v10, %v445_v39  ;;  %v543_v44 = vmul.f32 %v3251_v45, %v511_v42  ;;  %v544_v49 = vmul.f32 %v3251_v45, %v512_v7  ;;  %2355 = vmatpush3.bf16.msra.mxu0 %v2586_v35 }
  0xff   : > { %v393_v47 = vpop.xlane.xlu0 %392  ;;  %v395_v48 = vpop.xlane.xlu1 %394  ;;  %2455 = vmatpush3.bf16.msra.mxu1 %v2586_v35 }
 0x100   : > { %v446_v52 = vmul.f32 0.25, %v393_v47  ;;  %579 = vadd.xlane.f32.xlu1 %v542_v37  ;;  %581 = vadd.xlane.f32.xlu0 %v543_v44  ;;  %v447_v53 = vmul.f32 0.25, %v395_v48  ;;  %v513_v54 = vmul.f32 %v3294_v43, %v3294_v43  ;;  %v514_v9 = vmul.f32 %v3297_v8, %v3297_v8  ;;  %v2587_v47 = vld [vmem:[#allocation8 + $0x18] sm:$0xff]  }
 0x101   : > { %2356 = vmatprep.subr.bf16.mxu0 %v2587_v47  ;;  %2448 = vmatprep.subr.bf16.mxu1 %v2587_v47 }
 0x102   : > { %v3306_v10 = vsub.f32 %v3158_v11, %v446_v52  ;;  %v3309_v55 = vsub.f32 %v3161_v12, %v447_v53  ;;  %v545_v56 = vmul.f32 %v3251_v45, %v513_v54  ;;  %v546_v59 = vmul.f32 %v3251_v45, %v514_v9  ;;  %2357 = vmatpush3.bf16.msra.mxu0 %v2587_v47 }
 0x103   : > { %v397_v57 = vpop.xlane.xlu0 %396  ;;  %v399_v58 = vpop.xlane.xlu1 %398  ;;  %2456 = vmatpush3.bf16.msra.mxu1 %v2587_v47 }
 0x104   : > { %v448_v63 = vmul.f32 0.25, %v397_v57  ;;  %583 = vadd.xlane.f32.xlu1 %v544_v49  ;;  %585 = vadd.xlane.f32.xlu0 %v545_v56  ;;  %v449_v0 = vmul.f32 0.25, %v399_v58  ;;  %v515_v11 = vmul.f32 %v3306_v10, %v3306_v10  ;;  %v516_v12 = vmul.f32 %v3309_v55, %v3309_v55  ;;  %v2588_v58 = vld [vmem:[#allocation8 + $0x10] sm:$0xff]  }
 0x105   : > { %2358 = vmatprep.subr.bf16.mxu0 %v2588_v58  ;;  %2449 = vmatprep.subr.bf16.mxu1 %v2588_v58 }
 0x106   : > { %v3318_v1 = vsub.f32 %v3166_v13, %v448_v63  ;;  %v3321_v2 = vsub.f32 %v3169_v14, %v449_v0  ;;  %v547_v3 = vmul.f32 %v3251_v45, %v515_v11  ;;  %v548_v34 = vmul.f32 %v3251_v45, %v516_v12  ;;  %2359 = vmatpush3.bf16.msra.mxu0 %v2588_v58 }
 0x107   : > { %v401_v4 = vpop.xlane.xlu0 %400  ;;  %v403_v5 = vpop.xlane.xlu1 %402  ;;  %2457 = vmatpush3.bf16.msra.mxu1 %v2588_v58 }
 0x108   : > { %v450_v36 = vmul.f32 0.25, %v401_v4  ;;  %587 = vadd.xlane.f32.xlu1 %v546_v59  ;;  %589 = vadd.xlane.f32.xlu0 %v547_v3  ;;  %v451_v37 = vmul.f32 0.25, %v403_v5  ;;  %v517_v13 = vmul.f32 %v3318_v1, %v3318_v1  ;;  %v518_v14 = vmul.f32 %v3321_v2, %v3321_v2  ;;  %v2589_v5 = vld [vmem:[#allocation8 + $0x8] sm:$0xff]  }
 0x109   : > { %2360 = vmatprep.subr.bf16.mxu0 %v2589_v5  ;;  %2450 = vmatprep.subr.bf16.mxu1 %v2589_v5 }
 0x10a   : > { %v3330_v38 = vsub.f32 %v3174_v15, %v450_v36  ;;  %v3333_v39 = vsub.f32 %v3177_v16, %v451_v37  ;;  %v549_v42 = vmul.f32 %v3251_v45, %v517_v13  ;;  %v550_v46 = vmul.f32 %v3251_v45, %v518_v14  ;;  %2361 = vmatpush3.bf16.msra.mxu0 %v2589_v5 }
 0x10b   : > { %v405_v7 = vpop.xlane.xlu0 %404  ;;  %v407_v44 = vpop.xlane.xlu1 %406  ;;  %2458 = vmatpush3.bf16.msra.mxu1 %v2589_v5 }
 0x10c   : > { %v452_v48 = vmul.f32 0.25, %v405_v7  ;;  %591 = vadd.xlane.f32.xlu1 %v548_v34  ;;  %593 = vadd.xlane.f32.xlu0 %v549_v42  ;;  %v453_v49 = vmul.f32 0.25, %v407_v44  ;;  %v519_v15 = vmul.f32 %v3330_v38, %v3330_v38  ;;  %v520_v16 = vmul.f32 %v3333_v39, %v3333_v39  ;;  %v2590_v44 = vld [vmem:[#allocation8] sm:$0xff]  }
 0x10d   : > { %2362 = vmatprep.subr.bf16.mxu0 %v2590_v44  ;;  %2451 = vmatprep.subr.bf16.mxu1 %v2590_v44 }
 0x10e   : > { %v3342_v52 = vsub.f32 %v3182_v17, %v452_v48  ;;  %v3345_v53 = vsub.f32 %v3185_v18, %v453_v49  ;;  %v551_v54 = vmul.f32 %v3251_v45, %v519_v15  ;;  %v552_v57 = vmul.f32 %v3251_v45, %v520_v16  ;;  %2363 = vmatpush3.bf16.msra.mxu0 %v2590_v44 }
 0x10f   : > { %v409_v9 = vpop.xlane.xlu0 %408  ;;  %v411_v56 = vpop.xlane.xlu1 %410  ;;  %2459 = vmatpush3.bf16.msra.mxu1 %v2590_v44 }
 0x110   : > { %v454_v59 = vmul.f32 0.25, %v409_v9  ;;  %595 = vadd.xlane.f32.xlu1 %v550_v46  ;;  %597 = vadd.xlane.f32.xlu0 %v551_v54  ;;  %v455_v62 = vmul.f32 0.25, %v411_v56  ;;  %v521_v17 = vmul.f32 %v3342_v52, %v3342_v52  ;;  %v522_v18 = vmul.f32 %v3345_v53, %v3345_v53 }
 0x112   : > { %v3354_v63 = vsub.f32 %v3190_v19, %v454_v59  ;;  %v3357_v0 = vsub.f32 %v3193_v20, %v455_v62  ;;  %v553_v11 = vmul.f32 %v3251_v45, %v521_v17  ;;  %v554_v4 = vmul.f32 %v3251_v45, %v522_v18 }
 0x113   : > { %v413_v12 = vpop.xlane.xlu0 %412  ;;  %v415_v3 = vpop.xlane.xlu1 %414 }
 0x114   : > { %v456_v34 = vmul.f32 0.25, %v413_v12  ;;  %599 = vadd.xlane.f32.xlu1 %v552_v57  ;;  %601 = vadd.xlane.f32.xlu0 %v553_v11  ;;  %v457_v35 = vmul.f32 0.25, %v415_v3  ;;  %v523_v19 = vmul.f32 %v3354_v63, %v3354_v63  ;;  %v524_v20 = vmul.f32 %v3357_v0, %v3357_v0 }
 0x116   : > { %v3366_v36 = vsub.f32 %v3198_v21, %v456_v34  ;;  %v3369_v37 = vsub.f32 %v3201_v22, %v457_v35  ;;  %v555_v13 = vmul.f32 %v3251_v45, %v523_v19  ;;  %v556_v7 = vmul.f32 %v3251_v45, %v524_v20 }
 0x117   : > { %v417_v14 = vpop.xlane.xlu0 %416  ;;  %v419_v42 = vpop.xlane.xlu1 %418 }
 0x118   : > { %v458_v46 = vmul.f32 0.25, %v417_v14  ;;  %603 = vadd.xlane.f32.xlu1 %v554_v4  ;;  %605 = vadd.xlane.f32.xlu0 %v555_v13  ;;  %v459_v47 = vmul.f32 0.25, %v419_v42  ;;  %v525_v21 = vmul.f32 %v3366_v36, %v3366_v36  ;;  %v526_v22 = vmul.f32 %v3369_v37, %v3369_v37 }
 0x11a   : > { %v3378_v48 = vsub.f32 %v3206_v23, %v458_v46  ;;  %v3381_v49 = vsub.f32 %v3209_v24, %v459_v47  ;;  %v557_v15 = vmul.f32 %v3251_v45, %v525_v21  ;;  %v558_v9 = vmul.f32 %v3251_v45, %v526_v22 }
 0x11b   : > { %v421_v16 = vpop.xlane.xlu0 %420  ;;  %v423_v54 = vpop.xlane.xlu1 %422 }
 0x11c   : > { %v460_v56 = vmul.f32 0.25, %v421_v16  ;;  %607 = vadd.xlane.f32.xlu1 %v556_v7  ;;  %609 = vadd.xlane.f32.xlu0 %v557_v15  ;;  %v461_v57 = vmul.f32 0.25, %v423_v54  ;;  %v527_v58 = vmul.f32 %v3378_v48, %v3378_v48  ;;  %v528_v23 = vmul.f32 %v3381_v49, %v3381_v49 }
 0x11e   : > { %v3390_v24 = vsub.f32 %v3214_v25, %v460_v56  ;;  %v3393_v59 = vsub.f32 %v3217_v26, %v461_v57  ;;  %v559_v62 = vmul.f32 %v3251_v45, %v527_v58  ;;  %v560_v11 = vmul.f32 %v3251_v45, %v528_v23 }
 0x11f   : > { %v425_v17 = vpop.xlane.xlu0 %424  ;;  %v427_v18 = vpop.xlane.xlu1 %426 }
 0x120   : > { %v462_v12 = vmul.f32 0.25, %v425_v17  ;;  %611 = vadd.xlane.f32.xlu1 %v558_v9  ;;  %613 = vadd.xlane.f32.xlu0 %v559_v62  ;;  %v463_v3 = vmul.f32 0.25, %v427_v18  ;;  %v529_v4 = vmul.f32 %v3390_v24, %v3390_v24  ;;  %v530_v25 = vmul.f32 %v3393_v59, %v3393_v59 }
 0x122   : > { %v3402_v5 = vsub.f32 %v3222_v27, %v462_v12  ;;  %v3405_v26 = vsub.f32 %v3225_v28, %v463_v3  ;;  %v561_v34 = vmul.f32 %v3251_v45, %v529_v4  ;;  %v562_v20 = vmul.f32 %v3251_v45, %v530_v25 }
 0x123   : > { %v429_v35 = vpop.xlane.xlu0 %428  ;;  %v431_v19 = vpop.xlane.xlu1 %430 }
 0x124   : > { %v464_v13 = vmul.f32 0.25, %v429_v35  ;;  %615 = vadd.xlane.f32.xlu1 %v560_v11  ;;  %617 = vadd.xlane.f32.xlu0 %v561_v34  ;;  %v465_v14 = vmul.f32 0.25, %v431_v19  ;;  %v531_v42 = vmul.f32 %v3402_v5, %v3402_v5  ;;  %v532_v27 = vmul.f32 %v3405_v26, %v3405_v26 }
 0x126   : > { %v3414_v7 = vsub.f32 %v3230_v29, %v464_v13  ;;  %v3417_v28 = vsub.f32 %v3233_v30, %v465_v14  ;;  %v563_v44 = vmul.f32 %v3251_v45, %v531_v42  ;;  %v564_v21 = vmul.f32 %v3251_v45, %v532_v27 }
 0x127   : > { %v433_v46 = vpop.xlane.xlu0 %432  ;;  %v435_v47 = vpop.xlane.xlu1 %434 }
 0x128   : > { %v466_v22 = vmul.f32 0.25, %v433_v46  ;;  %619 = vadd.xlane.f32.xlu1 %v562_v20  ;;  %621 = vadd.xlane.f32.xlu0 %v563_v44  ;;  %v467_v15 = vmul.f32 0.25, %v435_v47  ;;  %v533_v16 = vmul.f32 %v3414_v7, %v3414_v7  ;;  %v534_v29 = vmul.f32 %v3417_v28, %v3417_v28 }
 0x12a   : > { %v3426_v54 = vsub.f32 %v3238_v31, %v466_v22  ;;  %v3429_v30 = vsub.f32 %v3241_v32, %v467_v15  ;;  %v565_v9 = vmul.f32 %v3251_v45, %v533_v16  ;;  %v566_v56 = vmul.f32 %v3251_v45, %v534_v29 }
 0x12c   : > { %623 = vadd.xlane.f32.xlu1 %v564_v21  ;;  %625 = vadd.xlane.f32.xlu0 %v565_v9  ;;  %v535_v57 = vmul.f32 %v3426_v54, %v3426_v54  ;;  %v536_v58 = vmul.f32 %v3429_v30, %v3429_v30 }
 0x12e   : > { %v567_v23 = vmul.f32 %v3251_v45, %v535_v57  ;;  %v568_v31 = vmul.f32 %v3251_v45, %v536_v58 }
 0x130   : > { %627 = vadd.xlane.f32.xlu1 %v566_v56  ;;  %629 = vadd.xlane.f32.xlu0 %v567_v23 }
 0x134   : > { %631 = vadd.xlane.f32.xlu1 %v568_v31 }
 0x17d   : > { %v570_v32 = vpop.xlane.xlu0 %569 }
 0x17e   : > { %v633_v62 = vmul.f32 0.25, %v570_v32 }
 0x180   : > { %v665_v17 = vadd.f32 1e-06, %v633_v62 }
 0x181   : > { %v572_v18 = vpop.xlane.xlu1 %571  ;;  %v574_v11 = vpop.xlane.xlu0 %573 }
 0x182   : > { %v634_v12 = vmul.f32 0.25, %v572_v18  ;;  %v635_v3 = vmul.f32 0.25, %v574_v11  ;;  %2591 = vrsqrt.f32 %v665_v17 }
 0x184   : > { %v666_v4 = vadd.f32 1e-06, %v634_v12  ;;  %v667_v25 = vadd.f32 1e-06, %v635_v3 }
 0x185   : > { %v576_v34 = vpop.xlane.xlu1 %575  ;;  %v578_v35 = vpop.xlane.xlu0 %577 }
 0x186   : > { %2593 = vrsqrt.f32 %v666_v4  ;;  %v636_v19 = vmul.f32 0.25, %v576_v34  ;;  %v637_v20 = vmul.f32 0.25, %v578_v35 }
 0x187   : > { %2595 = vrsqrt.f32 %v667_v25 }
 0x188   : > { %v668_v13 = vadd.f32 1e-06, %v636_v19  ;;  %v669_v14 = vadd.f32 1e-06, %v637_v20 }
 0x189   : > { %v580_v45 = vpop.xlane.xlu1 %579  ;;  %v582_v42 = vpop.xlane.xlu0 %581 }
 0x18a   : > { %2597 = vrsqrt.f32 %v668_v13  ;;  %v638_v27 = vmul.f32 0.25, %v580_v45  ;;  %v639_v44 = vmul.f32 0.25, %v582_v42 }
 0x18b   : > { %2599 = vrsqrt.f32 %v669_v14 }
 0x18c   : > { %v670_v46 = vadd.f32 1e-06, %v638_v27  ;;  %v671_v47 = vadd.f32 1e-06, %v639_v44 }
 0x18d   : > { %v584_v21 = vpop.xlane.xlu1 %583  ;;  %v586_v22 = vpop.xlane.xlu0 %585 }
 0x18e   : > { %2601 = vrsqrt.f32 %v670_v46  ;;  %v640_v15 = vmul.f32 0.25, %v584_v21  ;;  %v641_v16 = vmul.f32 0.25, %v586_v22 }
 0x18f   : > { %v2592_v29 = vpop.eup %2591  ;;  %2603 = vrsqrt.f32 %v671_v47 }
 0x190   : > { %v672_v9 = vadd.f32 1e-06, %v640_v15  ;;  %v673_v56 = vadd.f32 1e-06, %v641_v16  ;;  %v729_v62 = vmul.f32 %v2592_v29, %v3246_v40 }
 0x191   : > { %v588_v57 = vpop.xlane.xlu1 %587  ;;  %v590_v58 = vpop.xlane.xlu0 %589 }
 0x192   : > { %2605 = vrsqrt.f32 %v672_v9  ;;  %v642_v23 = vmul.f32 0.25, %v588_v57  ;;  %v643_v31 = vmul.f32 0.25, %v590_v58 }
 0x193   : > { %v2594_v32 = vpop.eup %2593  ;;  %2607 = vrsqrt.f32 %v673_v56 }
 0x194   : > { %v2596_v17 = vpop.eup %2595  ;;  %v674_v18 = vadd.f32 1e-06, %v642_v23  ;;  %v675_v11 = vadd.f32 1e-06, %v643_v31  ;;  %v730_v12 = vmul.f32 %v2594_v32, %v3258_v50 }
 0x195   : > { %v592_v3 = vpop.xlane.xlu1 %591  ;;  %v594_v4 = vpop.xlane.xlu0 %593  ;;  %v731_v20 = vmul.f32 %v2596_v17, %v3249_v41 }
 0x196   : > { %2609 = vrsqrt.f32 %v674_v18  ;;  %v644_v25 = vmul.f32 0.25, %v592_v3  ;;  %v645_v34 = vmul.f32 0.25, %v594_v4  ;;  %v761_v35 = vpack.c.bf16 %v730_v12, %v729_v62 }
 0x197   : > { %v2598_v19 = vpop.eup %2597  ;;  %2611 = vrsqrt.f32 %v675_v11 }
 0x198   : > { %v2600_v13 = vpop.eup %2599  ;;  %v676_v14 = vadd.f32 1e-06, %v644_v25  ;;  %v677_v45 = vadd.f32 1e-06, %v645_v34  ;;  %2364 = vmatprep.mubr.bf16.mxu0 %v761_v35  ;;  %v732_v40 = vmul.f32 %v2598_v19, %v3261_v51 }
 0x199   : > { %v596_v42 = vpop.xlane.xlu1 %595  ;;  %v598_v27 = vpop.xlane.xlu0 %597  ;;  %v733_v21 = vmul.f32 %v2600_v13, %v3270_v60 }
 0x19a   : > { %2613 = vrsqrt.f32 %v676_v14  ;;  %v646_v50 = vmul.f32 0.25, %v596_v42  ;;  %v647_v44 = vmul.f32 0.25, %v598_v27  ;;  %v762_v46 = vpack.c.bf16 %v732_v40, %v731_v20 }
 0x19b   : > { %v2602_v47 = vpop.eup %2601  ;;  %2615 = vrsqrt.f32 %v677_v45 }
 0x19c   : > { %v678_v22 = vadd.f32 1e-06, %v646_v50  ;;  %v679_v15 = vadd.f32 1e-06, %v647_v44  ;;  %2365 = vmatmul.mubr.bf16.vlgmr.msra.gmra.mxu0 %v762_v46  ;;  %v734_v41 = vmul.f32 %v2602_v47, %v3273_v61  ;;  %v2604_v16 = vpop.eup %2603 }
 0x19d   : > { %v600_v29 = vpop.xlane.xlu1 %599  ;;  %v602_v9 = vpop.xlane.xlu0 %601  ;;  %v735_v60 = vmul.f32 %v2604_v16, %v3282_v33 }
 0x19e   : > { %2617 = vrsqrt.f32 %v678_v22  ;;  %v648_v51 = vmul.f32 0.25, %v600_v29  ;;  %v649_v56 = vmul.f32 0.25, %v602_v9  ;;  %v763_v57 = vpack.c.bf16 %v734_v41, %v733_v21 }
 0x19f   : > { %v2606_v58 = vpop.eup %2605  ;;  %2619 = vrsqrt.f32 %v679_v15 }
 0x1a0   : > { %v680_v23 = vadd.f32 1e-06, %v648_v51  ;;  %v681_v31 = vadd.f32 1e-06, %v649_v56  ;;  %2368 = vmatprep.mubr.bf16.mxu0 %v763_v57  ;;  %v736_v32 = vmul.f32 %v2606_v58, %v3285_v6  ;;  %v2608_v62 = vpop.eup %2607 }
 0x1a1   : > { %v604_v17 = vpop.xlane.xlu1 %603  ;;  %v606_v18 = vpop.xlane.xlu0 %605  ;;  %v737_v34 = vmul.f32 %v2608_v62, %v3294_v43 }
 0x1a2   : > { %2621 = vrsqrt.f32 %v680_v23  ;;  %v650_v61 = vmul.f32 0.25, %v604_v17  ;;  %v651_v11 = vmul.f32 0.25, %v606_v18  ;;  %v764_v12 = vpack.c.bf16 %v736_v32, %v735_v60 }
 0x1a3   : > { %v2610_v3 = vpop.eup %2609  ;;  %2623 = vrsqrt.f32 %v681_v31 }
 0x1a4   : > { %v682_v4 = vadd.f32 1e-06, %v650_v61  ;;  %v683_v25 = vadd.f32 1e-06, %v651_v11  ;;  %2369 = vmatmul.mubr.bf16.gmra.mxu0 %v764_v12  ;;  %v738_v35 = vmul.f32 %v2610_v3, %v3297_v8  ;;  %v2612_v19 = vpop.eup %2611 }
 0x1a5   : > { %v608_v33 = vpop.xlane.xlu1 %607  ;;  %v610_v20 = vpop.xlane.xlu0 %609  ;;  %v739_v27 = vmul.f32 %v2612_v19, %v3306_v10 }
 0x1a6   : > { %2625 = vrsqrt.f32 %v682_v4  ;;  %v652_v6 = vmul.f32 0.25, %v608_v33  ;;  %v653_v13 = vmul.f32 0.25, %v610_v20  ;;  %v765_v14 = vpack.c.bf16 %v738_v35, %v737_v34 }
 0x1a7   : > { %v2614_v45 = vpop.eup %2613  ;;  %2627 = vrsqrt.f32 %v683_v25 }
 0x1a8   : > { %v684_v40 = vadd.f32 1e-06, %v652_v6  ;;  %v685_v42 = vadd.f32 1e-06, %v653_v13  ;;  %2372 = vmatprep.mubr.bf16.mxu0 %v765_v14  ;;  %v740_v50 = vmul.f32 %v2614_v45, %v3309_v55  ;;  %v2616_v44 = vpop.eup %2615 }
 0x1a9   : > { %v612_v43 = vpop.xlane.xlu1 %611  ;;  %v614_v46 = vpop.xlane.xlu0 %613  ;;  %v741_v29 = vmul.f32 %v2616_v44, %v3318_v1 }
 0x1aa   : > { %2629 = vrsqrt.f32 %v684_v40  ;;  %v654_v8 = vmul.f32 0.25, %v612_v43  ;;  %v655_v47 = vmul.f32 0.25, %v614_v46  ;;  %v766_v21 = vpack.c.bf16 %v740_v50, %v739_v27 }
 0x1ab   : > { %v2618_v22 = vpop.eup %2617  ;;  %2631 = vrsqrt.f32 %v685_v42 }
 0x1ac   : > { %v2620_v15 = vpop.eup %2619  ;;  %v686_v41 = vadd.f32 1e-06, %v654_v8  ;;  %v687_v16 = vadd.f32 1e-06, %v655_v47  ;;  %2373 = vmatmul.mubr.bf16.gmra.mxu0 %v766_v21  ;;  %v742_v9 = vmul.f32 %v2618_v22, %v3321_v2 }
 0x1ad   : > { %v616_v10 = vpop.xlane.xlu1 %615  ;;  %v618_v51 = vpop.xlane.xlu0 %617  ;;  %v743_v23 = vmul.f32 %v2620_v15, %v3330_v38 }
 0x1ae   : > { %2633 = vrsqrt.f32 %v686_v41  ;;  %v656_v55 = vmul.f32 0.25, %v616_v10  ;;  %v657_v56 = vmul.f32 0.25, %v618_v51  ;;  %v767_v57 = vpack.c.bf16 %v742_v9, %v741_v29 }
 0x1af   : > { %v2622_v58 = vpop.eup %2621  ;;  %2635 = vrsqrt.f32 %v687_v16 }
 0x1b0   : > { %v2624_v31 = vpop.eup %2623  ;;  %v688_v60 = vadd.f32 1e-06, %v656_v55  ;;  %v689_v32 = vadd.f32 1e-06, %v657_v56  ;;  %2376 = vmatprep.mubr.bf16.mxu0 %v767_v57  ;;  %v744_v62 = vmul.f32 %v2622_v58, %v3333_v39 }
 0x1b1   : > { %v620_v17 = vpop.xlane.xlu1 %619  ;;  %v622_v1 = vpop.xlane.xlu0 %621  ;;  %v745_v12 = vmul.f32 %v2624_v31, %v3342_v52 }
 0x1b2   : > { %2637 = vrsqrt.f32 %v688_v60  ;;  %v658_v2 = vmul.f32 0.25, %v620_v17  ;;  %v659_v18 = vmul.f32 0.25, %v622_v1  ;;  %v768_v61 = vpack.c.bf16 %v744_v62, %v743_v23 }
 0x1b3   : > { %v2626_v11 = vpop.eup %2625  ;;  %2639 = vrsqrt.f32 %v689_v32 }
 0x1b4   : > { %v2628_v3 = vpop.eup %2627  ;;  %v690_v4 = vadd.f32 1e-06, %v658_v2  ;;  %v691_v38 = vadd.f32 1e-06, %v659_v18  ;;  %2377 = vmatmul.mubr.bf16.gmra.mxu0 %v768_v61  ;;  %v746_v25 = vmul.f32 %v2626_v11, %v3345_v53 }
 0x1b5   : > { %v624_v34 = vpop.xlane.xlu1 %623  ;;  %v626_v35 = vpop.xlane.xlu0 %625  ;;  %v747_v6 = vmul.f32 %v2628_v3, %v3354_v63 }
 0x1b6   : > { %2641 = vrsqrt.f32 %v690_v4  ;;  %v660_v39 = vmul.f32 0.25, %v624_v34  ;;  %v661_v19 = vmul.f32 0.25, %v626_v35  ;;  %v769_v33 = vpack.c.bf16 %v746_v25, %v745_v12 }
 0x1b7   : > { %v2630_v20 = vpop.eup %2629  ;;  %2643 = vrsqrt.f32 %v691_v38 }
 0x1b8   : > { %v2632_v13 = vpop.eup %2631  ;;  %v692_v14 = vadd.f32 1e-06, %v660_v39  ;;  %v693_v52 = vadd.f32 1e-06, %v661_v19  ;;  %2380 = vmatprep.mubr.bf16.mxu1 %v769_v33  ;;  %v748_v45 = vmul.f32 %v2630_v20, %v3357_v0 }
 0x1b9   : > { %v628_v40 = vpop.xlane.xlu1 %627  ;;  %v630_v42 = vpop.xlane.xlu0 %629  ;;  %v749_v43 = vmul.f32 %v2632_v13, %v3366_v36 }
 0x1ba   : > { %2645 = vrsqrt.f32 %v692_v14  ;;  %v662_v53 = vmul.f32 0.25, %v628_v40  ;;  %v663_v27 = vmul.f32 0.25, %v630_v42  ;;  %v770_v50 = vpack.c.bf16 %v748_v45, %v747_v6 }
 0x1bb   : > { %v2634_v44 = vpop.eup %2633  ;;  %2647 = vrsqrt.f32 %v693_v52 }
 0x1bc   : > { %v694_v46 = vadd.f32 1e-06, %v662_v53  ;;  %v695_v8 = vadd.f32 1e-06, %v663_v27  ;;  %2381 = vmatmul.mubr.bf16.vlgmr.msra.gmra.mxu1 %v770_v50  ;;  %v750_v63 = vmul.f32 %v2634_v44, %v3369_v37  ;;  %v2636_v47 = vpop.eup %2635 }
 0x1bd   : > { %v632_v21 = vpop.xlane.xlu1 %631  ;;  %v751_v16 = vmul.f32 %v2636_v47, %v3378_v48 }
 0x1be   : > { %2649 = vrsqrt.f32 %v694_v46  ;;  %v664_v22 = vmul.f32 0.25, %v632_v21  ;;  %v771_v0 = vpack.c.bf16 %v750_v63, %v749_v43 }
 0x1bf   : > { %v2638_v15 = vpop.eup %2637  ;;  %2651 = vrsqrt.f32 %v695_v8 }
 0x1c0   : > { %v696_v41 = vadd.f32 1e-06, %v664_v22  ;;  %2384 = vmatprep.mubr.bf16.mxu1 %v771_v0  ;;  %v752_v29 = vmul.f32 %v2638_v15, %v3381_v49  ;;  %v2640_v36 = vpop.eup %2639 }
 0x1c1   : > { %v753_v37 = vmul.f32 %v2640_v36, %v3390_v24 }
 0x1c2   : > { %2653 = vrsqrt.f32 %v696_v41  ;;  %v772_v9 = vpack.c.bf16 %v752_v29, %v751_v16 }
 0x1c3   : > { %v2642_v10 = vpop.eup %2641 }
 0x1c4   : > { %2385 = vmatmul.mubr.bf16.gmra.mxu1 %v772_v9  ;;  %v754_v51 = vmul.f32 %v2642_v10, %v3393_v59  ;;  %v2644_v55 = vpop.eup %2643 }
 0x1c5   : > { %v755_v58 = vmul.f32 %v2644_v55, %v3402_v5  ;;  %v3474_v5 = vld [vmem:[%s3798_s2] ss:$0 sm:$0xff] }
 0x1c6   : > { %v773_v56 = vpack.c.bf16 %v754_v51, %v753_v37 }
 0x1c7   : > { %v2646_v57 = vpop.eup %2645 }
 0x1c8   : > { %2388 = vmatprep.mubr.bf16.mxu1 %v773_v56  ;;  %v756_v23 = vmul.f32 %v2646_v57, %v3405_v26  ;;  %v2648_v48 = vpop.eup %2647 }
 0x1c9   : > { %v757_v60 = vmul.f32 %v2648_v48, %v3414_v7 }
 0x1ca   : > { %v774_v31 = vpack.c.bf16 %v756_v23, %v755_v58 }
 0x1cb   : > { %v2650_v49 = vpop.eup %2649 }
 0x1cc   : > { %2389 = vmatmul.mubr.bf16.gmra.mxu1 %v774_v31  ;;  %v758_v32 = vmul.f32 %v2650_v49, %v3417_v28  ;;  %v2652_v62 = vpop.eup %2651 }
 0x1cd   : > { %v759_v59 = vmul.f32 %v2652_v62, %v3426_v54 }
 0x1ce   : > { %v775_v24 = vpack.c.bf16 %v758_v32, %v757_v60 }
 0x1cf   : > { %v2654_v17 = vpop.eup %2653 }
 0x1d0   : > { %2392 = vmatprep.mubr.bf16.mxu1 %v775_v24  ;;  %v760_v1 = vmul.f32 %v2654_v17, %v3429_v30 }
 0x1d2   : > { %v776_v2 = vpack.c.bf16 %v760_v1, %v759_v59 }
 0x1d4   : > { %2393 = vmatmul.mubr.bf16.gmra.mxu1 %v776_v2 }
 0x25c   : > { %v2366_v26 = vpop.f32.mrf.mxu0 }
 0x25d   : > { %v891_v7 = vadd.f32 %v2366_v26, %v3474_v5 }
 0x25e   : > { %v882_v18 = vpop.f32.mrf.mxu0 }
 0x25f   : > { %v1043_v28 = vmul.f32 0.70710677, %v891_v7  ;;  %v883_v61 = vadd.f32 %v3474_v5, %v882_v18  ;;  %v1011_v41 = vmul.f32 0.5, %v891_v7 }
 0x260   : > { %v2367_v11 = vpop.f32.mrf.mxu0 }
 0x261   : > { %2655 = verf.f32 %v1043_v28  ;;  %v1041_v12 = vmul.f32 0.70710677, %v883_v61  ;;  %v894_v54 = vadd.f32 %v2367_v11, %v3474_v5  ;;  %v1009_v22 = vmul.f32 0.5, %v883_v61 }
 0x262   : > { %v885_v30 = vpop.f32.mrf.mxu0 }
 0x263   : > { %2657 = verf.f32 %v1041_v12  ;;  %v1044_v3 = vmul.f32 0.70710677, %v894_v54  ;;  %v886_v4 = vadd.f32 %v3474_v5, %v885_v30  ;;  %v1012_v16 = vmul.f32 0.5, %v894_v54 }
 0x264   : > { %v2370_v38 = vpop.f32.mrf.mxu0 }
 0x265   : > { %2659 = verf.f32 %v1044_v3  ;;  %v1042_v25 = vmul.f32 0.70710677, %v886_v4  ;;  %v907_v34 = vadd.f32 %v2370_v38, %v3474_v5  ;;  %v1010_v36 = vmul.f32 0.5, %v886_v4 }
 0x266   : > { %v898_v35 = vpop.f32.mrf.mxu0 }
 0x267   : > { %2661 = verf.f32 %v1042_v25  ;;  %v1047_v39 = vmul.f32 0.70710677, %v907_v34  ;;  %v899_v19 = vadd.f32 %v3474_v5, %v898_v35  ;;  %v1015_v31 = vmul.f32 0.5, %v907_v34 }
 0x268   : > { %v2371_v33 = vpop.f32.mrf.mxu0 }
 0x269   : > { %2663 = verf.f32 %v1047_v39  ;;  %v1045_v20 = vmul.f32 0.70710677, %v899_v19  ;;  %v910_v6 = vadd.f32 %v2371_v33, %v3474_v5  ;;  %v1013_v24 = vmul.f32 0.5, %v899_v19 }
 0x26a   : > { %v901_v13 = vpop.f32.mrf.mxu0 }
 0x26b   : > { %2665 = verf.f32 %v1045_v20  ;;  %v1048_v14 = vmul.f32 0.70710677, %v910_v6  ;;  %v902_v52 = vadd.f32 %v3474_v5, %v901_v13  ;;  %v1016_v17 = vmul.f32 0.5, %v910_v6 }
 0x26c   : > { %v2374_v45 = vpop.f32.mrf.mxu0 }
 0x26d   : > { %2667 = verf.f32 %v1048_v14  ;;  %v1046_v40 = vmul.f32 0.70710677, %v902_v52  ;;  %v3485_v42 = vadd.f32 %v2374_v45, %v3474_v5  ;;  %v1014_v54 = vmul.f32 0.5, %v902_v52 }
 0x26e   : > { %v2656_v53 = vpop.eup %2655  ;;  %v914_v27 = vpop.f32.mrf.mxu0 }
 0x26f   : > { %2669 = verf.f32 %v1046_v40  ;;  %v1051_v50 = vmul.f32 0.70710677, %v3485_v42  ;;  %v3489_v43 = vadd.f32 %v3474_v5, %v914_v27  ;;  %v1107_v8 = vadd.f32 1.0, %v2656_v53 }
 0x270   : > { %v2658_v44 = vpop.eup %2657  ;;  %v2375_v46 = vpop.f32.mrf.mxu0  ;;  %v1019_v53 = vmul.f32 0.5, %v3485_v42 }
 0x271   : > { %v1105_v63 = vadd.f32 1.0, %v2658_v44  ;;  %2671 = verf.f32 %v1051_v50  ;;  %v3492_v47 = vadd.f32 %v2375_v46, %v3474_v5  ;;  %v1049_v0 = vmul.f32 0.70710677, %v3489_v43 }
 0x272   : > { %v2660_v21 = vpop.eup %2659  ;;  %v917_v15 = vpop.f32.mrf.mxu0  ;;  %v1139_v56 = vmul.f32 %v1107_v8, %v1011_v41 }
 0x273   : > { %v1108_v29 = vadd.f32 1.0, %v2660_v21  ;;  %v1137_v10 = vmul.f32 %v1105_v63, %v1009_v22  ;;  %2673 = verf.f32 %v1049_v0  ;;  %v1052_v37 = vmul.f32 0.70710677, %v3492_v47 }
 0x274   : > { %v2662_v9 = vpop.eup %2661  ;;  %v3497_v51 = vadd.f32 %v3474_v5, %v917_v15  ;;  %v2378_v55 = vpop.f32.mrf.mxu0  ;;  %v1334_v38 = vmul.f32 %v1139_v56, %v1139_v56  ;;  %v1017_v0 = vmul.f32 0.5, %v3489_v43 }
 0x275   : > { %v1140_v57 = vmul.f32 %v1108_v29, %v1012_v16  ;;  %v1106_v58 = vadd.f32 1.0, %v2662_v9  ;;  %v3500_v23 = vadd.f32 %v2378_v55, %v3474_v5  ;;  %2675 = verf.f32 %v1052_v37 }
 0x276   : > { %v2664_v48 = vpop.eup %2663  ;;  %v1050_v49 = vmul.f32 0.70710677, %v3497_v51  ;;  %v930_v60 = vpop.f32.mrf.mxu0  ;;  %v1332_v1 = vmul.f32 %v1137_v10, %v1137_v10  ;;  %v1020_v37 = vmul.f32 0.5, %v3492_v47 }
 0x277   : > { %v2134_v32 = vpack.c.bf16 %v1140_v57, %v1139_v56  ;;  %v1138_v62 = vmul.f32 %v1106_v58, %v1010_v36  ;;  %v1055_v2 = vmul.f32 0.70710677, %v3500_v23  ;;  %v3505_v26 = vadd.f32 %v3474_v5, %v930_v60 }
 0x278   : > { %v2666_v59 = vpop.eup %2665  ;;  %2677 = verf.f32 %v1050_v49  ;;  %v2379_v7 = vpop.f32.mrf.mxu0  ;;  %v1111_v61 = vadd.f32 1.0, %v2664_v48  ;;  %v1335_v19 = vmul.f32 %v1140_v57, %v1140_v57 }
 0x279   : > { %2270 = vst [vmem:[#allocation4] sm:$0xff] %v2134_v32   ;;  %v2129_v18 = vpack.c.bf16 %v1138_v62, %v1137_v10  ;;  %v1333_v28 = vmul.f32 %v1138_v62, %v1138_v62  ;;  %v1109_v11 = vadd.f32 1.0, %v2666_v59  ;;  %2679 = verf.f32 %v1055_v2 }
 0x27a   : > { %v2668_v12 = vpop.eup %2667  ;;  %v1053_v30 = vmul.f32 0.70710677, %v3505_v26  ;;  %v3509_v3 = vadd.f32 %v2379_v7, %v3474_v5  ;;  %v933_v4 = vpop.f32.mrf.mxu0  ;;  %v1143_v14 = vmul.f32 %v1111_v61, %v1015_v31  ;;  %v1018_v62 = vmul.f32 0.5, %v3497_v51 }
 0x27b   : > { %2130 = vst [vmem:[#allocation4 + $0x30] sm:$0xff] %v2129_v18   ;;  %v1365_v25 = vadd.f32 %v1333_v28, %v1332_v1  ;;  %v1141_v34 = vmul.f32 %v1109_v11, %v1013_v24  ;;  %v1112_v35 = vadd.f32 1.0, %v2668_v12  ;;  %v3513_v20 = vadd.f32 %v3474_v5, %v933_v4 }
 0x27c   : > { %v2670_v39 = vpop.eup %2669  ;;  %2681 = verf.f32 %v1053_v30  ;;  %v1056_v33 = vmul.f32 0.70710677, %v3509_v3  ;;  %v2382_v6 = vpop.f32.mrf.mxu1  ;;  %v1338_v57 = vmul.f32 %v1143_v14, %v1143_v14 }
 0x27d   : > { %v1366_v13 = vadd.f32 %v1365_v25, %v1334_v38  ;;  %v1144_v52 = vmul.f32 %v1112_v35, %v1016_v17  ;;  %v1110_v45 = vadd.f32 1.0, %v2670_v39  ;;  %v1054_v27 = vmul.f32 0.70710677, %v3513_v20 }
 0x27e   : > { %v2672_v40 = vpop.eup %2671  ;;  %2683 = verf.f32 %v1056_v33  ;;  %v3518_v50 = vadd.f32 %v2382_v6, %v3474_v5  ;;  %v946_v44 = vpop.f32.mrf.mxu1  ;;  %v1336_v46 = vmul.f32 %v1141_v34, %v1141_v34  ;;  %v1023_v38 = vmul.f32 0.5, %v3500_v23 }
 0x27f   : > { %v1367_v8 = vadd.f32 %v1366_v13, %v1335_v19  ;;  %v2144_v63 = vpack.c.bf16 %v1144_v52, %v1143_v14  ;;  %v1142_v21 = vmul.f32 %v1110_v45, %v1014_v54  ;;  %v1115_v22 = vadd.f32 1.0, %v2672_v40 }
 0x280   : > { %2685 = verf.f32 %v1054_v27  ;;  %v1059_v15 = vmul.f32 0.70710677, %v3518_v50  ;;  %v2383_v41 = vpop.f32.mrf.mxu1  ;;  %v2674_v16 = vpop.eup %2673  ;;  %v3523_v9 = vadd.f32 %v3474_v5, %v946_v44  ;;  %v1339_v49 = vmul.f32 %v1144_v52, %v1144_v52 }
 0x281   : > { %v1368_v42 = vadd.f32 %v1367_v8, %v1336_v46  ;;  %2272 = vst [vmem:[#allocation4 + $0x18] sm:$0xff] %v2144_v63   ;;  %v2139_v29 = vpack.c.bf16 %v1142_v21, %v1141_v34  ;;  %v1337_v36 = vmul.f32 %v1142_v21, %v1142_v21  ;;  %v1113_v10 = vadd.f32 1.0, %v2674_v16 }
 0x282   : > { %2687 = verf.f32 %v1059_v15  ;;  %v3527_v55 = vadd.f32 %v2383_v41, %v3474_v5  ;;  %v949_v43 = vpop.f32.mrf.mxu1  ;;  %v2676_v56 = vpop.eup %2675  ;;  %v1057_v48 = vmul.f32 0.70710677, %v3523_v9  ;;  %v1147_v59 = vmul.f32 %v1115_v22, %v1019_v53 }
 0x283   : > { %2271 = vst [vmem:[#allocation4 + $0x58] sm:$0xff] %v2139_v29   ;;  %v1369_v58 = vadd.f32 %v1368_v42, %v1337_v36  ;;  %v3531_v31 = vadd.f32 %v3474_v5, %v949_v43  ;;  %v1145_v60 = vmul.f32 %v1113_v10, %v1017_v0  ;;  %v1116_v32 = vadd.f32 1.0, %v2676_v56 }
 0x284   : > { %v2386_v47 = vpop.f32.mrf.mxu1  ;;  %2689 = verf.f32 %v1057_v48  ;;  %v1060_v1 = vmul.f32 0.70710677, %v3527_v55  ;;  %v1021_v25 = vmul.f32 0.5, %v3505_v26  ;;  %v1024_v19 = vmul.f32 0.5, %v3509_v3 }
 0x285   : > { %v2678_v24 = vpop.eup %2677  ;;  %v1370_v17 = vadd.f32 %v1369_v58, %v1338_v57  ;;  %v1340_v2 = vmul.f32 %v1145_v60, %v1145_v60  ;;  %v1148_v7 = vmul.f32 %v1116_v32, %v1020_v37  ;;  %v1058_v28 = vmul.f32 0.70710677, %v3531_v31 }
 0x286   : > { %v1114_v18 = vadd.f32 1.0, %v2678_v24  ;;  %v962_v61 = vpop.f32.mrf.mxu1  ;;  %v2680_v11 = vpop.eup %2679  ;;  %2691 = verf.f32 %v1060_v1  ;;  %v3537_v54 = vadd.f32 %v2386_v47, %v3474_v5  ;;  %v1022_v53 = vmul.f32 0.5, %v3513_v20 }
 0x287   : > { %v1371_v12 = vadd.f32 %v1370_v17, %v1339_v49  ;;  %v3540_v51 = vadd.f32 %v3474_v5, %v962_v61  ;;  %v2154_v30 = vpack.c.bf16 %v1148_v7, %v1147_v59  ;;  %2693 = verf.f32 %v1058_v28 }
 0x288   : > { %v1146_v4 = vmul.f32 %v1114_v18, %v1018_v62  ;;  %v2387_v34 = vpop.f32.mrf.mxu1  ;;  %v1063_v33 = vmul.f32 0.70710677, %v3537_v54  ;;  %v1119_v14 = vadd.f32 1.0, %v2680_v11  ;;  %v1342_v27 = vmul.f32 %v1147_v59, %v1147_v59 }
 0x289   : > { %v2682_v35 = vpop.eup %2681  ;;  %v1372_v39 = vadd.f32 %v1371_v12, %v1340_v2  ;;  %2274 = vst [vmem:[#allocation4 + $0x68] sm:$0xff] %v2154_v30   ;;  %v1061_v23 = vmul.f32 0.70710677, %v3540_v51  ;;  %v3549_v26 = vadd.f32 %v2387_v34, %v3474_v5  ;;  %v1343_v21 = vmul.f32 %v1148_v7, %v1148_v7 }
 0x28a   : > { %v2149_v6 = vpack.c.bf16 %v1146_v4, %v1145_v60  ;;  %v1341_v13 = vmul.f32 %v1146_v4, %v1146_v4  ;;  %v1117_v52 = vadd.f32 1.0, %v2682_v35  ;;  %v965_v45 = vpop.f32.mrf.mxu1  ;;  %2695 = verf.f32 %v1063_v33 }
 0x28b   : > { %v2684_v40 = vpop.eup %2683  ;;  %2697 = verf.f32 %v1061_v23  ;;  %v1064_v22 = vmul.f32 0.70710677, %v3549_v26  ;;  %v3553_v0 = vadd.f32 %v3474_v5, %v965_v45  ;;  %v1151_v15 = vmul.f32 %v1119_v14, %v1023_v38 }
 0x28c   : > { %2273 = vst [vmem:[#allocation4 + $0x50] sm:$0xff] %v2149_v6   ;;  %v1373_v3 = vadd.f32 %v1372_v39, %v1341_v13  ;;  %v1149_v44 = vmul.f32 %v1117_v52, %v1021_v25  ;;  %v1120_v46 = vadd.f32 1.0, %v2684_v40  ;;  %v2390_v8 = vpop.f32.mrf.mxu1  ;;  %v1027_v36 = vmul.f32 0.5, %v3518_v50 }
 0x28d   : > { %v2686_v63 = vpop.eup %2685  ;;  %2699 = verf.f32 %v1064_v22  ;;  %v1062_v10 = vmul.f32 0.70710677, %v3553_v0  ;;  %v3558_v37 = vadd.f32 %v2390_v8, %v3474_v5  ;;  %v1025_v60 = vmul.f32 0.5, %v3523_v9 }
 0x28e   : > { %v1374_v20 = vadd.f32 %v1373_v3, %v1342_v27  ;;  %v1152_v41 = vmul.f32 %v1120_v46, %v1024_v19  ;;  %v1118_v16 = vadd.f32 1.0, %v2686_v63  ;;  %v978_v42 = vpop.f32.mrf.mxu1  ;;  %v1344_v43 = vmul.f32 %v1149_v44, %v1149_v44 }
 0x28f   : > { %v2688_v29 = vpop.eup %2687  ;;  %2701 = verf.f32 %v1062_v10  ;;  %v1067_v32 = vmul.f32 0.70710677, %v3558_v37  ;;  %v3563_v17 = vadd.f32 %v3474_v5, %v978_v42  ;;  %v1346_v1 = vmul.f32 %v1151_v15, %v1151_v15 }
 0x290   : > { %v1375_v56 = vadd.f32 %v1374_v20, %v1343_v21  ;;  %v2164_v57 = vpack.c.bf16 %v1152_v41, %v1151_v15  ;;  %v1150_v58 = vmul.f32 %v1118_v16, %v1022_v53  ;;  %v2391_v48 = vpop.f32.mrf.mxu1  ;;  %v1123_v49 = vadd.f32 1.0, %v2688_v29 }
 0x291   : > { %v2690_v62 = vpop.eup %2689  ;;  %v1028_v7 = vmul.f32 0.5, %v3527_v55  ;;  %v3567_v18 = vadd.f32 %v2391_v48, %v3474_v5  ;;  %2703 = verf.f32 %v1067_v32  ;;  %v1065_v61 = vmul.f32 0.70710677, %v3563_v17 }
 0x292   : > { %v1376_v47 = vadd.f32 %v1375_v56, %v1344_v43  ;;  %2276 = vst [vmem:[#allocation4 + $0x48] sm:$0xff] %v2164_v57   ;;  %v2159_v50 = vpack.c.bf16 %v1150_v58, %v1149_v44  ;;  %v1345_v24 = vmul.f32 %v1150_v58, %v1150_v58  ;;  %v981_v59 = vpop.f32.mrf.mxu1  ;;  %v1121_v2 = vadd.f32 1.0, %v2690_v62 }
 0x293   : > { %v2692_v9 = vpop.eup %2691  ;;  %v3571_v11 = vadd.f32 %v3474_v5, %v981_v59  ;;  %v1347_v30 = vmul.f32 %v1152_v41, %v1152_v41  ;;  %v1026_v25 = vmul.f32 0.5, %v3531_v31  ;;  %v1155_v35 = vmul.f32 %v1123_v49, %v1027_v36 }
 0x294   : > { %2275 = vst [vmem:[#allocation4 + $0x8] sm:$0xff] %v2159_v50   ;;  %v1377_v28 = vadd.f32 %v1376_v47, %v1345_v24  ;;  %v2394_v12 = vpop.f32.mrf.mxu1  ;;  %v1153_v4 = vmul.f32 %v1121_v2, %v1025_v60  ;;  %v1124_v38 = vadd.f32 1.0, %v2692_v9  ;;  %v2694_v34 = vpop.eup %2693  ;;  %2705 = verf.f32 %v1065_v61 }
 0x295   : > { %v1068_v39 = vmul.f32 0.70710677, %v3567_v18  ;;  %v1122_v13 = vadd.f32 1.0, %v2694_v34  ;;  %v1066_v14 = vmul.f32 0.70710677, %v3571_v11  ;;  %v3577_v40 = vadd.f32 %v2394_v12, %v3474_v5 }
 0x296   : > { %v1378_v55 = vadd.f32 %v1377_v28, %v1346_v1  ;;  %v994_v19 = vpop.f32.mrf.mxu1  ;;  %v1348_v33 = vmul.f32 %v1153_v4, %v1153_v4  ;;  %v1156_v6 = vmul.f32 %v1124_v38, %v1028_v7  ;;  %v1031_v3 = vmul.f32 0.5, %v3537_v54 }
 0x297   : > { %v2696_v52 = vpop.eup %2695  ;;  %2707 = verf.f32 %v1068_v39  ;;  %v3580_v31 = vadd.f32 %v3474_v5, %v994_v19  ;;  %v1154_v27 = vmul.f32 %v1122_v13, %v1026_v25  ;;  %v1029_v44 = vmul.f32 0.5, %v3540_v51 }
 0x298   : > { %v1379_v45 = vadd.f32 %v1378_v55, %v1347_v30  ;;  %v2395_v53 = vpop.f32.mrf.mxu1  ;;  %v2174_v23 = vpack.c.bf16 %v1156_v6, %v1155_v35  ;;  %v2698_v46 = vpop.eup %2697  ;;  %v1032_v63 = vmul.f32 0.5, %v3549_v26  ;;  %2709 = verf.f32 %v1066_v14 }
 0x299   : > { %v1071_v21 = vmul.f32 0.70710677, %v3577_v40  ;;  %v2169_v22 = vpack.c.bf16 %v1154_v27, %v1153_v4  ;;  %v1349_v20 = vmul.f32 %v1154_v27, %v1154_v27  ;;  %v1127_v15 = vadd.f32 1.0, %v2696_v52 }
 0x29a   : > { %v1380_v8 = vadd.f32 %v1379_v45, %v1348_v33  ;;  %2278 = vst [vmem:[#allocation4 + $0x20] sm:$0xff] %v2174_v23   ;;  %v1125_v41 = vadd.f32 1.0, %v2698_v46  ;;  %v997_v16 = vpop.f32.mrf.mxu1  ;;  %v2700_v42 = vpop.eup %2699  ;;  %v1030_v29 = vmul.f32 0.5, %v3553_v0  ;;  %v1069_v54 = vmul.f32 0.70710677, %v3580_v31 }
 0x29b   : > { %2711 = verf.f32 %v1071_v21  ;;  %v1006_v51 = vadd.f32 %v2395_v53, %v3474_v5  ;;  %v1350_v36 = vmul.f32 %v1155_v35, %v1155_v35  ;;  %2277 = vst [vmem:[#allocation4 + $0x40] sm:$0xff] %v2169_v22   ;;  %v1128_v43 = vadd.f32 1.0, %v2700_v42 }
 0x29c   : > { %v1381_v26 = vadd.f32 %v1380_v8, %v1349_v20  ;;  %v1157_v10 = vmul.f32 %v1125_v41, %v1029_v44  ;;  %v2702_v56 = vpop.eup %2701  ;;  %v1351_v57 = vmul.f32 %v1156_v6, %v1156_v6  ;;  %2713 = verf.f32 %v1069_v54 }
 0x29d   : > { %v1072_v58 = vmul.f32 0.70710677, %v1006_v51  ;;  %v998_v48 = vadd.f32 %v3474_v5, %v997_v16  ;;  %v1159_v60 = vmul.f32 %v1127_v15, %v1031_v3  ;;  %v1160_v32 = vmul.f32 %v1128_v43, %v1032_v63 }
 0x29e   : > { %v1382_v49 = vadd.f32 %v1381_v26, %v1350_v36  ;;  %v1126_v0 = vadd.f32 1.0, %v2702_v56  ;;  %v2704_v47 = vpop.eup %2703  ;;  %v1352_v50 = vmul.f32 %v1157_v10, %v1157_v10  ;;  %v1033_v5 = vmul.f32 0.5, %v3563_v17 }
 0x29f   : > { %2715 = verf.f32 %v1072_v58  ;;  %v1070_v62 = vmul.f32 0.70710677, %v998_v48  ;;  %v2184_v59 = vpack.c.bf16 %v1160_v32, %v1159_v60  ;;  %v1131_v61 = vadd.f32 1.0, %v2704_v47 }
 0x2a0   : > { %v1383_v24 = vadd.f32 %v1382_v49, %v1351_v57  ;;  %v1158_v1 = vmul.f32 %v1126_v0, %v1030_v29  ;;  %v1354_v4 = vmul.f32 %v1159_v60, %v1159_v60  ;;  %v1035_v25 = vmul.f32 0.5, %v3558_v37 }
 0x2a1   : > { %2717 = verf.f32 %v1070_v62  ;;  %v2706_v2 = vpop.eup %2705  ;;  %2280 = vst [vmem:[#allocation4 + $0x38] sm:$0xff] %v2184_v59   ;;  %v1036_v55 = vmul.f32 0.5, %v3567_v18  ;;  %v1355_v19 = vmul.f32 %v1160_v32, %v1160_v32  ;;  %v1034_v14 = vmul.f32 0.5, %v3571_v11 }
 0x2a2   : > { %v1384_v7 = vadd.f32 %v1383_v24, %v1352_v50  ;;  %v2179_v9 = vpack.c.bf16 %v1158_v1, %v1157_v10  ;;  %v1353_v28 = vmul.f32 %v1158_v1, %v1158_v1  ;;  %v1129_v12 = vadd.f32 1.0, %v2706_v2  ;;  %v1364_v2 = vld [vmem:[#allocation2] sm:$0x1] }
 0x2a3   : > { %v1163_v6 = vmul.f32 %v1131_v61, %v1035_v25  ;;  %v1037_v37 = vmul.f32 0.5, %v3580_v31  ;;  %v1039_v22 = vmul.f32 0.5, %v3577_v40  ;;  %v1040_v20 = vmul.f32 0.5, %v1006_v51 }
 0x2a4   : > { %v2708_v30 = vpop.eup %2707  ;;  %2279 = vst [vmem:[#allocation4 + $0x10] sm:$0xff] %v2179_v9   ;;  %v1385_v38 = vadd.f32 %v1384_v7, %v1353_v28  ;;  %v1161_v34 = vmul.f32 %v1129_v12, %v1033_v5  ;;  %v1038_v54 = vmul.f32 0.5, %v998_v48 }
 0x2a5   : > { %v1132_v35 = vadd.f32 1.0, %v2708_v30  ;;  %v2710_v39 = vpop.eup %2709  ;;  %v1358_v11 = vmul.f32 %v1163_v6, %v1163_v6 }
 0x2a6   : > { %v1386_v33 = vadd.f32 %v1385_v38, %v1354_v4  ;;  %v1130_v52 = vadd.f32 1.0, %v2710_v39  ;;  %v1356_v45 = vmul.f32 %v1161_v34, %v1161_v34 }
 0x2a7   : > { %v1164_v13 = vmul.f32 %v1132_v35, %v1036_v55 }
 0x2a8   : > { %v2712_v17 = vpop.eup %2711  ;;  %v1387_v53 = vadd.f32 %v1386_v33, %v1355_v19  ;;  %v1162_v27 = vmul.f32 %v1130_v52, %v1034_v14 }
 0x2a9   : > { %v2194_v23 = vpack.c.bf16 %v1164_v13, %v1163_v6  ;;  %v2714_v3 = vpop.eup %2713  ;;  %v1135_v8 = vadd.f32 1.0, %v2712_v17  ;;  %v1359_v29 = vmul.f32 %v1164_v13, %v1164_v13 }
 0x2aa   : > { %v1388_v44 = vadd.f32 %v1387_v53, %v1356_v45  ;;  %v2189_v18 = vpack.c.bf16 %v1162_v27, %v1161_v34  ;;  %v1357_v46 = vmul.f32 %v1162_v27, %v1162_v27  ;;  %v1133_v63 = vadd.f32 1.0, %v2714_v3 }
 0x2ab   : > { %2282 = vst [vmem:[#allocation4 + $0x70] sm:$0xff] %v2194_v23   ;;  %v1167_v26 = vmul.f32 %v1135_v8, %v1039_v22 }
 0x2ac   : > { %v2716_v21 = vpop.eup %2715  ;;  %2281 = vst [vmem:[#allocation4 + $0x60] sm:$0xff] %v2189_v18   ;;  %v1389_v15 = vadd.f32 %v1388_v44, %v1357_v46  ;;  %v1165_v41 = vmul.f32 %v1133_v63, %v1037_v37 }
 0x2ad   : > { %v1136_v16 = vadd.f32 1.0, %v2716_v21  ;;  %v1362_v60 = vmul.f32 %v1167_v26, %v1167_v26 }
 0x2ae   : > { %v2718_v42 = vpop.eup %2717  ;;  %v1390_v36 = vadd.f32 %v1389_v15, %v1358_v11  ;;  %v1360_v43 = vmul.f32 %v1165_v41, %v1165_v41 }
 0x2af   : > { %v1168_v31 = vmul.f32 %v1136_v16, %v1040_v20  ;;  %v1134_v10 = vadd.f32 1.0, %v2718_v42 }
 0x2b0   : > { %v1391_v56 = vadd.f32 %v1390_v36, %v1359_v29 }
 0x2b1   : > { %v2204_v57 = vpack.c.bf16 %v1168_v31, %v1167_v26  ;;  %v1166_v58 = vmul.f32 %v1134_v10, %v1038_v54  ;;  %v1363_v0 = vmul.f32 %v1168_v31, %v1168_v31 }
 0x2b2   : > { %v1392_v49 = vadd.f32 %v1391_v56, %v1360_v43 }
 0x2b3   : > { %2284 = vst [vmem:[#allocation4 + $0x28] sm:$0xff] %v2204_v57   ;;  %v2199_v40 = vpack.c.bf16 %v1166_v58, %v1165_v41  ;;  %v1361_v51 = vmul.f32 %v1166_v58, %v1166_v58 }
 0x2b5   : > { %2283 = vst [vmem:[#allocation4 + $0x78] sm:$0xff] %v2199_v40   ;;  %v1393_v32 = vadd.f32 %v1392_v49, %v1361_v51 }
 0x2b7   : > { %v1394_v62 = vadd.f32 %v1393_v32, %v1362_v60 }
 0x2b9   : > { %v1395_v47 = vadd.f32 %v1394_v62, %v1363_v0 }
 0x2bb   : > { %v1396_v50 = vrot.slane %v1395_v47, 4 }
 0x2bd   : > { %v1397_v48 = vadd.f32 %v1396_v50, %v1395_v47 }
 0x2bf   : > { %v1398_v24 = vrot.slane %v1397_v48, 2 }
 0x2c1   : > { %v1399_v59 = vadd.f32 %v1398_v24, %v1397_v48 }
 0x2c3   : > { %v1400_v1 = vrot.slane %v1399_v59, 1 }
 0x2c5   : > { %v1401_v7 = vadd.f32 %v1400_v1, %v1399_v59 }
 0x2c7   : > { %v1402_v9 = vadd.f32 %v1401_v7, %v1364_v2 }
 0x2c9   : > { %1403 = vst [vmem:[#allocation2] sm:$0x1] %v1402_v9 }
 0x2ca PF: > { %p1404_p2 = scmp.eq.s32.totalorder %s2895_s24, 1 }
 0x2cb   : > { %vm1417_vm3 = vcmask (%p1404_p2), 1040384   ;;  %v1423_v39 = vld [vmem:[%s3801_s5] sm:$0x1] (%p1404_p2) }
 0x2cc   : > { %1408 = sbr.rel (!%p1404_p2) target bundleno = 903 (0x387), region = 68 }
 0x2d0   : > { %v1409_v28 = vld [vmem:[#allocation2] sm:$0x1] (%p1404_p2) }
 0x2d1   : > { %2719 = vrsqrt.f32 %v1409_v28  ;;  %vm1412_vm1 = vcmp.eq.f32.partialorder %v1409_v28, inf  ;;  %v1415_v5 = vand.u32 2147483648, %v1409_v28  ;;  %vm1414_vm2 = vcmp.eq.f32.partialorder %v1409_v28, 0.0 }
 0x2de   : > { %v2720_v61 = vpop.eup %2719 }
 0x2df   : > { %v1411_v12 = vmul.f32 %v2720_v61, %v1409_v28 }
 0x2e1   : > { %v1413_v30 = vsel %vm1412_vm1, %v1409_v28, %v1411_v12 }
 0x2e2   : > { %v1416_v4 = vsel %vm1414_vm2, %v1415_v5, %v1413_v30 }
 0x2e3   : > { %v1418_v38 = vsel %vm1417_vm3, %v1416_v4, 0.0 }
 0x2e4   : > { %1419 = vadd.xlane.f32.xlu0 %v1418_v38 }
 0x36d   : > { %v1420_v25 = vpop.xlane.xlu0 %1419 }
 0x36e   : > { %v1421_v34 = vmul.f32 0.0625, %v1420_v25 }
 0x370   : > { %v1422_v55 = vadd.f32 1e-06, %v1421_v34 }
 0x372   : > { %2721 = vrcp.f32 %v1422_v55 }
 0x37f   : > { %v2722_v35 = vpop.eup %2721 }
 0x380   : > { %v1425_v19 = vmul.f32 %v2722_v35, %v1416_v4 }
 0x382   : > { %v1426_v33 = vmul.f32 %v1425_v19, %v1423_v39 }
 0x384   : > { %v1427_v6 = vadd.f32 1.0, %v1426_v33 }
 0x386   : > { %1428 = vst [vmem:[#allocation3] sm:$0x1] %v1427_v6 }
 0x387 PF: > { %p2074_p12 = scmp.ne.s32.totalorder %s2895_s24, 1 }
 0x389   : > { %1431 = sbr.rel (%p2074_p12) target bundleno = 1171 (0x493), region = 72 }
 0x38e   : > { %v2723_v13 = vld [vmem:[#allocation10 + $0x38] sm:$0xff]   ;;  %v2724_v14 = vld [vmem:[#allocation10 + $0x30] sm:$0xff]   ;;  %v2725_v52 = vld [vmem:[#allocation10 + $0x28] sm:$0xff]  }
 0x38f   : > { %2396 = vmatprep.subr.bf16.mxu0 %v2723_v13  ;;  %2460 = vmatprep.subr.bf16.mxu1 %v2723_v13  ;;  %v2726_v17 = vld [vmem:[#allocation10 + $0x20] sm:$0xff]   ;;  %v2207_v45 = vld [vmem:[#allocation4 + $0x30] sm:$0xff]   ;;  %v3601_v53 = vld [vmem:[#allocation3] ss:$0 sm:$0xff] }
 0x390   : > { %2397 = vmatpush3.bf16.msra.mxu0 %v2723_v13  ;;  %2468 = vmatpush3.bf16.msra.mxu1 %v2723_v13  ;;  %v2292_v23 = vld [vmem:[#allocation4 + $0x40] sm:$0xff]   ;;  %v2208_v27 = vunpack.c.l.bf16 %v2207_v45  ;;  %v2209_v3 = vunpack.c.h.bf16 %v2207_v45  ;;  %v2727_v63 = vld [vmem:[#allocation10 + $0x18] sm:$0xff]   ;;  %v2728_v11 = vld [vmem:[#allocation10 + $0x10] sm:$0xff]  }
 0x391   : > { %2398 = vmatprep.subr.bf16.mxu0 %v2724_v14  ;;  %2461 = vmatprep.subr.bf16.mxu1 %v2724_v14  ;;  %v2240_v44 = vunpack.c.l.bf16 %v2292_v23  ;;  %v2241_v37 = vunpack.c.h.bf16 %v2292_v23  ;;  %v2285_v15 = vld [vmem:[#allocation4] sm:$0xff]   ;;  %v2286_v16 = vld [vmem:[#allocation4 + $0x58] sm:$0xff]   ;;  %v2729_v42 = vld [vmem:[#allocation10 + $0x8] sm:$0xff]  }
 0x392   : > { %v1506_v18 = vmul.f32 %v2208_v27, %v3601_v53  ;;  %v1507_v46 = vmul.f32 %v2209_v3, %v3601_v53  ;;  %v2293_v41 = vld [vmem:[#allocation4 + $0x20] sm:$0xff]   ;;  %v2294_v29 = vld [vmem:[#allocation4 + $0x10] sm:$0xff]   ;;  %v2212_v54 = vunpack.c.l.bf16 %v2285_v15  ;;  %v2213_v36 = vunpack.c.h.bf16 %v2285_v15  ;;  %v2287_v0 = vld [vmem:[#allocation4 + $0x18] sm:$0xff]  }
 0x393   : > { %v1522_v8 = vmul.f32 %v2240_v44, %v3601_v53  ;;  %v1523_v21 = vmul.f32 %v2241_v37, %v3601_v53  ;;  %v2244_v26 = vunpack.c.l.bf16 %v2293_v41  ;;  %v2245_v31 = vunpack.c.h.bf16 %v2293_v41  ;;  %v2730_v58 = vld [vmem:[#allocation10] sm:$0xff]   ;;  %v2295_v62 = vld [vmem:[#allocation4 + $0x38] sm:$0xff]   ;;  %v2288_v24 = vld [vmem:[#allocation4 + $0x50] sm:$0xff]  }
 0x394   : > { %2399 = vmatpush3.bf16.msra.mxu0 %v2724_v14  ;;  %2469 = vmatpush3.bf16.msra.mxu1 %v2724_v14  ;;  %v1538_v22 = vpack.c.bf16 %v1507_v46, %v1506_v18  ;;  %v2216_v10 = vunpack.c.l.bf16 %v2286_v16  ;;  %v2217_v43 = vunpack.c.h.bf16 %v2286_v16  ;;  %v2248_v56 = vunpack.c.l.bf16 %v2294_v29  ;;  %v2296_v59 = vld [vmem:[#allocation4 + $0x60] sm:$0xff]   ;;  %v2289_v6 = vld [vmem:[#allocation4 + $0x68] sm:$0xff]   ;;  %v2298_v45 = vld [vmem:[#allocation4 + $0x78] sm:$0xff]  }
 0x395   : > { %2400 = vmatprep.subr.bf16.mxu0 %v2725_v52  ;;  %2462 = vmatprep.subr.bf16.mxu1 %v2725_v52  ;;  %v1546_v20 = vpack.c.bf16 %v1523_v21, %v1522_v8  ;;  %v2249_v57 = vunpack.c.h.bf16 %v2294_v29  ;;  %v1508_v49 = vmul.f32 %v2212_v54, %v3601_v53  ;;  %v1509_v40 = vmul.f32 %v2213_v36, %v3601_v53  ;;  %v2291_v29 = vld [vmem:[#allocation4 + $0x48] sm:$0xff]  }
 0x396   : > { %2412 = vmatprep.mubr.bf16.mxu0 %v1538_v22  ;;  %v1524_v51 = vmul.f32 %v2244_v26, %v3601_v53  ;;  %v1525_v60 = vmul.f32 %v2245_v31, %v3601_v53  ;;  %v1510_v32 = vmul.f32 %v2216_v10, %v3601_v53  ;;  %v1511_v47 = vmul.f32 %v2217_v43, %v3601_v53  ;;  %v2299_v31 = vld [vmem:[#allocation4 + $0x28] sm:$0xff]  }
 0x397   : > { %2428 = vmatprep.mubr.bf16.mxu1 %v1546_v20  ;;  %v1526_v50 = vmul.f32 %v2248_v56, %v3601_v53  ;;  %v1527_v48 = vmul.f32 %v2249_v57, %v3601_v53  ;;  %v2220_v1 = vunpack.c.l.bf16 %v2287_v0  ;;  %v2221_v2 = vunpack.c.h.bf16 %v2287_v0 }
 0x398   : > { %2401 = vmatpush3.bf16.msra.mxu0 %v2725_v52  ;;  %2470 = vmatpush3.bf16.msra.mxu1 %v2725_v52  ;;  %v2252_v7 = vunpack.c.l.bf16 %v2295_v62  ;;  %v2253_v9 = vunpack.c.h.bf16 %v2295_v62  ;;  %v1539_v28 = vpack.c.bf16 %v1509_v40, %v1508_v49  ;;  %v1547_v61 = vpack.c.bf16 %v1525_v60, %v1524_v51  ;;  %v2297_v52 = vld [vmem:[#allocation4 + $0x70] sm:$0xff]  }
 0x399   : > { %2402 = vmatprep.subr.bf16.mxu0 %v2726_v17  ;;  %2463 = vmatprep.subr.bf16.mxu1 %v2726_v17  ;;  %v2224_v5 = vunpack.c.l.bf16 %v2288_v24  ;;  %v2225_v12 = vunpack.c.h.bf16 %v2288_v24  ;;  %v1540_v30 = vpack.c.bf16 %v1511_v47, %v1510_v32  ;;  %v1548_v4 = vpack.c.bf16 %v1527_v48, %v1526_v50  ;;  %v3638_v48 = vld [vmem:[%s3800_s4] ss:$0 sm:$0xff] }
 0x39a   : > { %v2256_v38 = vunpack.c.l.bf16 %v2296_v59  ;;  %v2257_v25 = vunpack.c.h.bf16 %v2296_v59  ;;  %v1512_v34 = vmul.f32 %v2220_v1, %v3601_v53  ;;  %v1513_v55 = vmul.f32 %v2221_v2, %v3601_v53  ;;  %v1788_v59 = vld [vmem:[%s3103_s17 + $0x10] sm:$0xff] }
 0x39b   : > { %v1528_v35 = vmul.f32 %v2252_v7, %v3601_v53  ;;  %v1529_v39 = vmul.f32 %v2253_v9, %v3601_v53  ;;  %v1514_v19 = vmul.f32 %v2224_v5, %v3601_v53  ;;  %v1515_v33 = vmul.f32 %v2225_v12, %v3601_v53  ;;  %v1804_v2 = vld [vmem:[%s3103_s17 + $0x90] sm:$0xff]  ;;  %v1802_v5 = vld [vmem:[%s3103_s17 + $0x80] sm:$0xff] }
 0x39c   : > { %2403 = vmatpush3.bf16.msra.mxu0 %v2726_v17  ;;  %2471 = vmatpush3.bf16.msra.mxu1 %v2726_v17  ;;  %v1530_v13 = vmul.f32 %v2256_v38, %v3601_v53  ;;  %v1531_v14 = vmul.f32 %v2257_v25, %v3601_v53  ;;  %v2290_v17 = vld [vmem:[#allocation4 + $0x8] sm:$0xff]   ;;  %v1541_v23 = vpack.c.bf16 %v1513_v55, %v1512_v34  ;;  %v2228_v3 = vunpack.c.l.bf16 %v2289_v6  ;;  %v1789_v34 = vld [vmem:[%s3103_s17 + $0x18] sm:$0xff] }
 0x39d   : > { %2404 = vmatprep.subr.bf16.mxu0 %v2727_v63  ;;  %2464 = vmatprep.subr.bf16.mxu1 %v2727_v63  ;;  %v1549_v27 = vpack.c.bf16 %v1529_v39, %v1528_v35  ;;  %v2229_v44 = vunpack.c.h.bf16 %v2289_v6  ;;  %v1542_v37 = vpack.c.bf16 %v1515_v33, %v1514_v19  ;;  %v2260_v18 = vunpack.c.l.bf16 %v2297_v52  ;;  %v1805_v35 = vld [vmem:[%s3103_s17 + $0x98] sm:$0xff] }
 0x39e   : > { %v2261_v46 = vunpack.c.h.bf16 %v2297_v52  ;;  %v2232_v8 = vunpack.c.l.bf16 %v2290_v17  ;;  %v2233_v21 = vunpack.c.h.bf16 %v2290_v17  ;;  %v2264_v22 = vunpack.c.l.bf16 %v2298_v45  ;;  %v1803_v17 = vld [vmem:[%s3103_s17 + $0x88] sm:$0xff] }
 0x39f   : > { %v2265_v20 = vunpack.c.h.bf16 %v2298_v45  ;;  %v1517_v15 = vmul.f32 %v2229_v44, %v3601_v53  ;;  %v1532_v41 = vmul.f32 %v2260_v18, %v3601_v53  ;;  %v2236_v43 = vunpack.c.l.bf16 %v2291_v29 }
 0x3a0   : > { %2405 = vmatpush3.bf16.msra.mxu0 %v2727_v63  ;;  %2472 = vmatpush3.bf16.msra.mxu1 %v2727_v63  ;;  %v1550_v63 = vpack.c.bf16 %v1531_v14, %v1530_v13  ;;  %v1533_v16 = vmul.f32 %v2261_v46, %v3601_v53  ;;  %v1519_v54 = vmul.f32 %v2233_v21, %v3601_v53  ;;  %v2237_v57 = vunpack.c.h.bf16 %v2291_v29  ;;  %v1787_v14 = vld [vmem:[%s3103_s17 + $0x8] sm:$0xff]  ;;  %v1808_v46 = vld [vmem:[%s3103_s17 + $0xb0] sm:$0xff] }
 0x3a1   : > { %2406 = vmatprep.subr.bf16.mxu0 %v2728_v11  ;;  %2465 = vmatprep.subr.bf16.mxu1 %v2728_v11  ;;  %v1534_v36 = vmul.f32 %v2264_v22, %v3601_v53  ;;  %v1535_v26 = vmul.f32 %v2265_v20, %v3601_v53  ;;  %v2269_v49 = vunpack.c.h.bf16 %v2299_v31  ;;  %v1520_v60 = vmul.f32 %v2236_v43, %v3601_v53 }
 0x3a2   : > { %v1551_v56 = vpack.c.bf16 %v1533_v16, %v1532_v41  ;;  %v1521_v32 = vmul.f32 %v2237_v57, %v3601_v53  ;;  %v1806_v41 = vld [vmem:[%s3103_s17 + $0xa0] sm:$0xff] }
 0x3a3   : > { %v1552_v51 = vpack.c.bf16 %v1535_v26, %v1534_v36  ;;  %v1537_v62 = vmul.f32 %v2269_v49, %v3601_v53  ;;  %v1793_v26 = vld [vmem:[%s3103_s17 + $0x38] sm:$0xff] }
 0x3a4   : > { %2407 = vmatpush3.bf16.msra.mxu0 %v2728_v11  ;;  %2473 = vmatpush3.bf16.msra.mxu1 %v2728_v11  ;;  %v1516_v11 = vmul.f32 %v2228_v3, %v3601_v53  ;;  %v1545_v47 = vpack.c.bf16 %v1521_v32, %v1520_v60  ;;  %v1807_v60 = vld [vmem:[%s3103_s17 + $0xa8] sm:$0xff] }
 0x3a5   : > { %2408 = vmatprep.subr.bf16.mxu0 %v2729_v42  ;;  %2466 = vmatprep.subr.bf16.mxu1 %v2729_v42 }
 0x3a6   : > { %v1543_v10 = vpack.c.bf16 %v1517_v15, %v1516_v11  ;;  %v1790_v11 = vld [vmem:[%s3103_s17 + $0x20] sm:$0xff] }
 0x3a8   : > { %2409 = vmatpush3.bf16.msra.mxu0 %v2729_v42  ;;  %2474 = vmatpush3.bf16.msra.mxu1 %v2729_v42  ;;  %v1518_v42 = vmul.f32 %v2232_v8, %v3601_v53 }
 0x3a9   : > { %2410 = vmatprep.subr.bf16.mxu0 %v2730_v58  ;;  %2467 = vmatprep.subr.bf16.mxu1 %v2730_v58 }
 0x3aa   : > { %v1544_v40 = vpack.c.bf16 %v1519_v54, %v1518_v42 }
 0x3ac   : > { %2411 = vmatpush3.bf16.msra.mxu0 %v2730_v58  ;;  %2475 = vmatpush3.bf16.msra.mxu1 %v2730_v58  ;;  %v2268_v58 = vunpack.c.l.bf16 %v2299_v31 }
 0x3ae   : > { %v1536_v0 = vmul.f32 %v2268_v58, %v3601_v53 }
 0x3af   : > { %2413 = vmatmul.mubr.bf16.vlgmr.msra.gmra.mxu0 %v1539_v28  ;;  %2429 = vmatmul.mubr.bf16.vlgmr.msra.gmra.mxu1 %v1547_v61  ;;  %v1786_v28 = vld [vmem:[%s3103_s17] sm:$0xff] }
 0x3b0   : > { %2416 = vmatprep.mubr.bf16.mxu0 %v1540_v30  ;;  %2432 = vmatprep.mubr.bf16.mxu1 %v1548_v4  ;;  %v1553_v50 = vpack.c.bf16 %v1537_v62, %v1536_v0 }
 0x3b7   : > { %2417 = vmatmul.mubr.bf16.gmra.mxu0 %v1541_v23  ;;  %2433 = vmatmul.mubr.bf16.gmra.mxu1 %v1549_v27 }
 0x3b8   : > { %2420 = vmatprep.mubr.bf16.mxu0 %v1542_v37  ;;  %2436 = vmatprep.mubr.bf16.mxu1 %v1550_v63  ;;  %v1792_v37 = vld [vmem:[%s3103_s17 + $0x30] sm:$0xff] }
 0x3bf   : > { %2421 = vmatmul.mubr.bf16.gmra.mxu0 %v1543_v10  ;;  %2437 = vmatmul.mubr.bf16.gmra.mxu1 %v1551_v56  ;;  %v1809_v10 = vld [vmem:[%s3103_s17 + $0xb8] sm:$0xff] }
 0x3c0   : > { %2424 = vmatprep.mubr.bf16.mxu0 %v1544_v40  ;;  %2440 = vmatprep.mubr.bf16.mxu1 %v1552_v51  ;;  %v1791_v40 = vld [vmem:[%s3103_s17 + $0x28] sm:$0xff] }
 0x3c7   : > { %2425 = vmatmul.mubr.bf16.gmra.mxu0 %v1545_v47  ;;  %2441 = vmatmul.mubr.bf16.gmra.mxu1 %v1553_v50 }
 0x46f   : > { %v2414_v24 = vpop.f32.mrf.mxu0  ;;  %v2430_v1 = vpop.f32.mrf.mxu1 }
 0x470   : > { %v1668_v53 = vadd.f32 %v2414_v24, %v3638_v48  ;;  %v1732_v7 = vadd.f32 %v2430_v1, %v3638_v48  ;;  %v1796_v24 = vld [vmem:[%s3103_s17 + $0x50] sm:$0xff] }
 0x471   : > { %v1659_v9 = vpop.f32.mrf.mxu0  ;;  %v1723_v61 = vpop.f32.mrf.mxu1  ;;  %v1812_v1 = vld [vmem:[%s3103_s17 + $0xd0] sm:$0xff] }
 0x472   : > { %v1820_v12 = vadd.f32 %v1788_v59, %v1668_v53  ;;  %v1836_v30 = vadd.f32 %v1804_v2, %v1732_v7  ;;  %v1660_v4 = vadd.f32 %v3638_v48, %v1659_v9  ;;  %v1724_v38 = vadd.f32 %v3638_v48, %v1723_v61  ;;  %v1794_v61 = vld [vmem:[%s3103_s17 + $0x40] sm:$0xff] }
 0x473   : > { %v2415_v25 = vpop.f32.mrf.mxu0  ;;  %v2431_v55 = vpop.f32.mrf.mxu1 }
 0x474   : > { %1852 = vst [vmem:[%s3114_s1 + $0x10] sm:$0xff] %v1820_v12  ;;  %1868 = vst [vmem:[%s3114_s1 + $0x90] sm:$0xff] %v1836_v30  ;;  %v1818_v39 = vadd.f32 %v1786_v28, %v1660_v4  ;;  %v1834_v19 = vadd.f32 %v1802_v5, %v1724_v38  ;;  %v1671_v33 = vadd.f32 %v2415_v25, %v3638_v48  ;;  %v1810_v12 = vld [vmem:[%s3103_s17 + $0xc0] sm:$0xff] }
 0x475   : > { %v1735_v6 = vadd.f32 %v2431_v55, %v3638_v48  ;;  %v1662_v13 = vpop.f32.mrf.mxu0  ;;  %v1726_v52 = vpop.f32.mrf.mxu1  ;;  %v1797_v55 = vld [vmem:[%s3103_s17 + $0x58] sm:$0xff] }
 0x476   : > { %1850 = vst [vmem:[%s3114_s1] sm:$0xff] %v1818_v39  ;;  %1866 = vst [vmem:[%s3114_s1 + $0x80] sm:$0xff] %v1834_v19  ;;  %v1821_v45 = vadd.f32 %v1789_v34, %v1671_v33  ;;  %v1663_v27 = vadd.f32 %v3638_v48, %v1662_v13  ;;  %v1727_v3 = vadd.f32 %v3638_v48, %v1726_v52  ;;  %v1813_v39 = vld [vmem:[%s3103_s17 + $0xd8] sm:$0xff]  ;;  %v1795_v52 = vld [vmem:[%s3103_s17 + $0x48] sm:$0xff] }
 0x477   : > { %v1837_v23 = vadd.f32 %v1805_v35, %v1735_v6  ;;  %v2418_v44 = vpop.f32.mrf.mxu0  ;;  %v2434_v18 = vpop.f32.mrf.mxu1 }
 0x478   : > { %1853 = vst [vmem:[%s3114_s1 + $0x18] sm:$0xff] %v1821_v45  ;;  %v1819_v8 = vadd.f32 %v1787_v14, %v1663_v27  ;;  %v1835_v63 = vadd.f32 %v1803_v17, %v1727_v3  ;;  %v1684_v21 = vadd.f32 %v2418_v44, %v3638_v48  ;;  %v1748_v22 = vadd.f32 %v2434_v18, %v3638_v48  ;;  %v1811_v45 = vld [vmem:[%s3103_s17 + $0xc8] sm:$0xff]  ;;  %v1800_v18 = vld [vmem:[%s3103_s17 + $0x70] sm:$0xff] }
 0x479   : > { %1869 = vst [vmem:[%s3114_s1 + $0x98] sm:$0xff] %v1837_v23  ;;  %v1675_v20 = vpop.f32.mrf.mxu0  ;;  %v1739_v15 = vpop.f32.mrf.mxu1 }
 0x47a   : > { %1851 = vst [vmem:[%s3114_s1 + $0x8] sm:$0xff] %v1819_v8  ;;  %1867 = vst [vmem:[%s3114_s1 + $0x88] sm:$0xff] %v1835_v63  ;;  %v1824_v16 = vadd.f32 %v1792_v37, %v1684_v21  ;;  %v1840_v42 = vadd.f32 %v1808_v46, %v1748_v22  ;;  %v1676_v29 = vadd.f32 %v3638_v48, %v1675_v20  ;;  %v1816_v8 = vld [vmem:[%s3103_s17 + $0xf0] sm:$0xff] }
 0x47b   : > { %v1740_v54 = vadd.f32 %v3638_v48, %v1739_v15  ;;  %v2419_v36 = vpop.f32.mrf.mxu0  ;;  %v2435_v31 = vpop.f32.mrf.mxu1  ;;  %v1798_v15 = vld [vmem:[%s3103_s17 + $0x60] sm:$0xff] }
 0x47c   : > { %1856 = vst [vmem:[%s3114_s1 + $0x30] sm:$0xff] %v1824_v16  ;;  %1872 = vst [vmem:[%s3114_s1 + $0xb0] sm:$0xff] %v1840_v42  ;;  %v1822_v43 = vadd.f32 %v1790_v11, %v1676_v29  ;;  %v1687_v57 = vadd.f32 %v2419_v36, %v3638_v48  ;;  %v1751_v58 = vadd.f32 %v2435_v31, %v3638_v48  ;;  %v1814_v16 = vld [vmem:[%s3103_s17 + $0xe0] sm:$0xff]  ;;  %v1801_v31 = vld [vmem:[%s3103_s17 + $0x78] sm:$0xff] }
 0x47d   : > { %v1838_v56 = vadd.f32 %v1806_v41, %v1740_v54  ;;  %v1678_v49 = vpop.f32.mrf.mxu0  ;;  %v1742_v51 = vpop.f32.mrf.mxu1 }
 0x47e   : > { %1854 = vst [vmem:[%s3114_s1 + $0x20] sm:$0xff] %v1822_v43  ;;  %v1825_v32 = vadd.f32 %v1793_v26, %v1687_v57  ;;  %v1841_v0 = vadd.f32 %v1809_v10, %v1751_v58  ;;  %v1679_v62 = vadd.f32 %v3638_v48, %v1678_v49  ;;  %v1743_v47 = vadd.f32 %v3638_v48, %v1742_v51  ;;  %v1817_v43 = vld [vmem:[%s3103_s17 + $0xf8] sm:$0xff]  ;;  %v1799_v51 = vld [vmem:[%s3103_s17 + $0x68] sm:$0xff] }
 0x47f   : > { %1870 = vst [vmem:[%s3114_s1 + $0xa0] sm:$0xff] %v1838_v56  ;;  %v2422_v50 = vpop.f32.mrf.mxu0  ;;  %v2438_v59 = vpop.f32.mrf.mxu1 }
 0x480   : > { %1857 = vst [vmem:[%s3114_s1 + $0x38] sm:$0xff] %v1825_v32  ;;  %1873 = vst [vmem:[%s3114_s1 + $0xb8] sm:$0xff] %v1841_v0  ;;  %v1823_v2 = vadd.f32 %v1791_v40, %v1679_v62  ;;  %v1839_v53 = vadd.f32 %v1807_v60, %v1743_v47  ;;  %v1700_v7 = vadd.f32 %v2422_v50, %v3638_v48  ;;  %v1815_v32 = vld [vmem:[%s3103_s17 + $0xe8] sm:$0xff] }
 0x481   : > { %v1764_v9 = vadd.f32 %v2438_v59, %v3638_v48  ;;  %v1691_v28 = vpop.f32.mrf.mxu0  ;;  %v1755_v5 = vpop.f32.mrf.mxu1 }
 0x482   : > { %1855 = vst [vmem:[%s3114_s1 + $0x28] sm:$0xff] %v1823_v2  ;;  %1871 = vst [vmem:[%s3114_s1 + $0xa8] sm:$0xff] %v1839_v53  ;;  %v1828_v30 = vadd.f32 %v1796_v24, %v1700_v7  ;;  %v1692_v38 = vadd.f32 %v3638_v48, %v1691_v28  ;;  %v1756_v25 = vadd.f32 %v3638_v48, %v1755_v5 }
 0x483   : > { %v1844_v4 = vadd.f32 %v1812_v1, %v1764_v9  ;;  %v2423_v34 = vpop.f32.mrf.mxu0  ;;  %v2439_v35 = vpop.f32.mrf.mxu1 }
 0x484   : > { %1860 = vst [vmem:[%s3114_s1 + $0x50] sm:$0xff] %v1828_v30  ;;  %v1826_v19 = vadd.f32 %v1794_v61, %v1692_v38  ;;  %v1842_v33 = vadd.f32 %v1810_v12, %v1756_v25  ;;  %v1703_v6 = vadd.f32 %v2423_v34, %v3638_v48  ;;  %v1767_v13 = vadd.f32 %v2439_v35, %v3638_v48 }
 0x485   : > { %1876 = vst [vmem:[%s3114_s1 + $0xd0] sm:$0xff] %v1844_v4  ;;  %v1694_v14 = vpop.f32.mrf.mxu0  ;;  %v1758_v17 = vpop.f32.mrf.mxu1 }
 0x486   : > { %1858 = vst [vmem:[%s3114_s1 + $0x40] sm:$0xff] %v1826_v19  ;;  %1874 = vst [vmem:[%s3114_s1 + $0xc0] sm:$0xff] %v1842_v33  ;;  %v1829_v23 = vadd.f32 %v1797_v55, %v1703_v6  ;;  %v1845_v27 = vadd.f32 %v1813_v39, %v1767_v13  ;;  %v1695_v3 = vadd.f32 %v3638_v48, %v1694_v14 }
 0x487   : > { %v1759_v44 = vadd.f32 %v3638_v48, %v1758_v17  ;;  %v2426_v37 = vpop.f32.mrf.mxu0  ;;  %v2442_v46 = vpop.f32.mrf.mxu1 }
 0x488   : > { %1861 = vst [vmem:[%s3114_s1 + $0x58] sm:$0xff] %v1829_v23  ;;  %1877 = vst [vmem:[%s3114_s1 + $0xd8] sm:$0xff] %v1845_v27  ;;  %v1827_v63 = vadd.f32 %v1795_v52, %v1695_v3  ;;  %v1716_v22 = vadd.f32 %v2426_v37, %v3638_v48  ;;  %v1780_v20 = vadd.f32 %v2442_v46, %v3638_v48 }
 0x489   : > { %v1843_v21 = vadd.f32 %v1811_v45, %v1759_v44  ;;  %v1707_v11 = vpop.f32.mrf.mxu0  ;;  %v1771_v41 = vpop.f32.mrf.mxu1 }
 0x48a   : > { %1859 = vst [vmem:[%s3114_s1 + $0x48] sm:$0xff] %v1827_v63  ;;  %v1832_v42 = vadd.f32 %v1800_v18, %v1716_v22  ;;  %v1848_v29 = vadd.f32 %v1816_v8, %v1780_v20  ;;  %v1708_v54 = vadd.f32 %v3638_v48, %v1707_v11  ;;  %v1772_v36 = vadd.f32 %v3638_v48, %v1771_v41 }
 0x48b   : > { %1875 = vst [vmem:[%s3114_s1 + $0xc8] sm:$0xff] %v1843_v21  ;;  %v2427_v26 = vpop.f32.mrf.mxu0  ;;  %v2443_v10 = vpop.f32.mrf.mxu1 }
 0x48c   : > { %1864 = vst [vmem:[%s3114_s1 + $0x70] sm:$0xff] %v1832_v42  ;;  %1880 = vst [vmem:[%s3114_s1 + $0xf0] sm:$0xff] %v1848_v29  ;;  %v1830_v56 = vadd.f32 %v1798_v15, %v1708_v54  ;;  %v1846_v57 = vadd.f32 %v1814_v16, %v1772_v36  ;;  %v1719_v58 = vadd.f32 %v2427_v26, %v3638_v48 }
 0x48d   : > { %v1783_v49 = vadd.f32 %v2443_v10, %v3638_v48  ;;  %v1710_v40 = vpop.f32.mrf.mxu0  ;;  %v1774_v60 = vpop.f32.mrf.mxu1 }
 0x48e   : > { %1862 = vst [vmem:[%s3114_s1 + $0x60] sm:$0xff] %v1830_v56  ;;  %1878 = vst [vmem:[%s3114_s1 + $0xe0] sm:$0xff] %v1846_v57  ;;  %v1833_v0 = vadd.f32 %v1801_v31, %v1719_v58  ;;  %v1711_v47 = vadd.f32 %v3638_v48, %v1710_v40  ;;  %v1775_v50 = vadd.f32 %v3638_v48, %v1774_v60 }
 0x48f   : > { %v1849_v62 = vadd.f32 %v1817_v43, %v1783_v49 }
 0x490   : > { %1865 = vst [vmem:[%s3114_s1 + $0x78] sm:$0xff] %v1833_v0  ;;  %v1831_v24 = vadd.f32 %v1799_v51, %v1711_v47  ;;  %v1847_v59 = vadd.f32 %v1815_v32, %v1775_v50 }
 0x491   : > { %1881 = vst [vmem:[%s3114_s1 + $0xf8] sm:$0xff] %v1849_v62 }
 0x492   : > { %1863 = vst [vmem:[%s3114_s1 + $0x68] sm:$0xff] %v1831_v24  ;;  %1879 = vst [vmem:[%s3114_s1 + $0xe8] sm:$0xff] %v1847_v59 }
 0x493 PF: > { %s2125_s13 = sshll.u32 %s2899_s25, 12  ;;  %s1899_s19 = sshll.u32 %s3114_s1, 4  ;;  %s3743_s19 = int_to_ptr.vmem [resolvable:$true] %s1899_s19 }
 0x494   : > { %s3740_s18 = scalar_lea.hbm %s3802_s6, %s2125_s13  ;;  %s1883_s20 = scalar_lea.sflag [#allocation7], %s3099_s16 }
 0x495   : > { %s2811_s14 = scalar_lea.vmem %s3743_s19, 4096  ;;  %s2922_s12 = smov [#allocation11]  }
 0x496   : > { %p2812_p13 = scmp.ne.s32.totalorder %s3743_s19, %s2811_s14  ;;  %s2815_s15 = sshll.u32 %s2922_s12, 4  ;;  %s2816_s15 = int_to_ptr.vmem [resolvable:$false] %s2815_s15 }
 0x497   : > { %s2817_s25 = scalar_lea.vmem %s2816_s15, 8192  ;;  %p2818_p1 = scmp.lt.s32.totalorder %s3743_s19, %s2816_s15 }
 0x498   : > { %p2813_p3 = pnand %p2812_p13, %p3069_p5  ;;  %p2819_p4 = scmp.lt.s32.totalorder %s2817_s25, %s2811_s14 }
 0x49a   : > { %p2814_p0 = pneg %p2813_p3  ;;  %p2820_p6 = por %p2819_p4, %p2818_p1 }
 0x49c   : > { %p2821_p11 = pnand %p2820_p6, %p2814_p0 }
 0x49e   : > { %2824 = shalt.err (!%p2821_p11)
}
 0x49f   : > { %s2825_s17 = scalar_lea.hbm %s3740_s18, 4096  ;;  %s2829_s7 = scalar_lea.hbm %s3802_s6, 8192 }
 0x4a0   : > { %p2826_p10 = scmp.ne.s32.totalorder %s3740_s18, %s2825_s17  ;;  %p2830_p9 = scmp.lt.s32.totalorder %s3740_s18, %s3802_s6 }
 0x4a1   : > { %p2831_p2 = scmp.lt.s32.totalorder %s2829_s7, %s2825_s17 }
 0x4a2   : > { %p2827_p7 = pnand %p2826_p10, %p3069_p5 }
 0x4a3   : > { %p2832_p12 = por %p2831_p2, %p2830_p9 }
 0x4a4   : > { %p2828_p8 = pneg %p2827_p7 }
 0x4a6   : > { %p2833_p13 = pnand %p2832_p12, %p2828_p8 }
 0x4a8   : > { %2836 = shalt.err (!%p2833_p13)
}
 0x4a9   : > { %s2923_s24 = smov 128   ;;  %s2924_s11 = smov 8  }
 0x4aa   : > { %2486 = dma.vmem_to_hbm [thread:$0]  (%p3069_p5), %s3743_s19, 4096, %s3740_s18, %s1883_s20, %s2923_s24, %s2923_s24, %s2924_s11  }
 0x4ab PF: > { %s3828_s13 = sld [smem:[#allocation16_spill]]  ;;  %p2508_p3 = scmp.ge.s32.totalorder %s2911_s28, 2 }
 0x4ac   : > { %s1914_s8 = sand.u32 1, %s2883_s21  }
 0x4ad   : > { %s1915_s30 = scalar_lea.sflag [#allocation7], %s1914_s8 }
 0x4b1   : > { %p3829_p0 = scmp.ne.s32.totalorder %s3828_s13, 0 }
 0x4b3   : > { %p2500_p1 = pnand %p2508_p3, %p3829_p0 }
 0x4b5   : > { %p2501_p4 = pneg %p2500_p1 }
 0x4b7   : > { %2878 = dma.done.wait (%p2501_p4), %s1915_s30, 4096  }
 0x4b8   : > { %2880 = vsyncadd (%p2501_p4), %s1915_s30, 4294963200  ;;  %s23_s28 = sadd.s32 1, %s2911_s28   ;;  %s3830_s24 = sld [smem:[#allocation15_spill]] }
 0x4b9   : > { %p20_p6 = scmp.ge.s32.totalorder %s23_s28, 6   ;;  %s3831_s29 = sld [smem:[#allocation17_spill]] }
 0x4ba   : > { %s3832_s16 = sld [smem:[#allocation18_spill]]  ;;  %s3833_s21 = smov %s2887_s22 }
 0x4bb   : > { %s3834_s22 = smov %s2891_s23  ;;  %s3835_s23 = smov %s3090_s26 }
 0x4bc   : > { %s3836_s25 = smov %s2907_s27  ;;  %22 = sbr.rel (!%p20_p6) target bundleno = 11 (0xb), region = 115 }
 0x4bf   : > { %s3837_s26 = smov %s3831_s29 }
 0x4c0   : > { %s3838_s27 = smov %s3832_s16 }
 0x4c1   :  { %1920 = vsyncpa [#allocation6], 1 }
 0x4c2   :  { %1922 = vsyncpa [#allocation6 + $0x1], 1 }
 0x4c3   :  { %1923 = vsyncpa [#allocation9], 1 }
 0x4c4   :  { %1924 = vsyncpa [#allocation7], 1 }
 0x4c5   :  { %1926 = vsyncpa [#allocation7 + $0x1], 1 }

</bundles_post_ra>
